<compile_context>
chip_gen: v7x
topology: tpu7x:2x2x1
jax: 0.10.0
libtpu: 0.0.40
codegen_flags: <defaults>
</compile_context>

<pallas_src>
import functools
import math

import jax
import jax.numpy as jnp
from jax import lax
from jax.experimental import pallas as pl
from jax.experimental.pallas import tpu as pltpu


def _layernorm(x, g, b, eps=1e-6):
    mu = jnp.mean(x, axis=-1, keepdims=True)
    var = jnp.mean((x - mu) ** 2, axis=-1, keepdims=True)
    return (x - mu) * lax.rsqrt(var + eps) * g + b


def transformer_block_kernel(
    x_ref,
    ln1g_ref, ln1b_ref,
    wqkv_ref, bqkv_ref,
    wproj_ref, bproj_ref,
    ln2g_ref, ln2b_ref,
    wfc1_ref, bfc1_ref, wfc2_ref, bfc2_ref,
    o_ref,
    ctx_ref,                       # VMEM scratch (M, D) bf16: lane-concat ctx slab
    *, num_heads, seq_len,
):
    M, D = x_ref.shape             # M = batch_tile * seq_len
    bt = M // seq_len
    dh = D // num_heads

    # residual stream in f32, batch tile already flattened into rows (M)
    x = x_ref[...].astype(jnp.float32)

    # ---- norm1 (f32 statistics) ----
    hb = _layernorm(x, ln1g_ref[...], ln1b_ref[...]).astype(jnp.bfloat16)

    # ---- fused QKV projection: one (M,D)@(D,3D) bf16 matmul, f32 accumulate.
    # 1/sqrt(dh) is already folded into the q columns of wqkv / bqkv.
    qkv = jnp.dot(hb, wqkv_ref[...], preferred_element_type=jnp.float32) + bqkv_ref[...]
    qkv_b = qkv.astype(jnp.bfloat16)

    # ---- multi-head self-attention, per (batch item, head) with 2-D tiles ----
    # Each head's context is written into the (M, D) VMEM slab at its static
    # lane offset; the output projection then runs ONCE with full-D contraction.
    for b in range(bt):
        rows = slice(b * seq_len, (b + 1) * seq_len)
        for hd in range(num_heads):
            lo = hd * dh
            qh = qkv_b[rows, lo:lo + dh]                       # (S, dh) bf16
            kh = qkv_b[rows, D + lo:D + lo + dh]
            vh = qkv_b[rows, 2 * D + lo:2 * D + lo + dh]
            # NT dot_general: no explicit transpose
            s = lax.dot_general(qh, kh, (((1,), (1,)), ((), ())),
                                preferred_element_type=jnp.float32)   # (S, S)
            s = s - jnp.max(s, axis=-1, keepdims=True)
            p = jnp.exp(s)                                     # unnormalized
            l = jnp.sum(p, axis=-1, keepdims=True)
            ctx = jnp.dot(p.astype(jnp.bfloat16), vh,
                          preferred_element_type=jnp.float32)         # (S, dh)
            ctx = ctx / l                                      # exact f32 normalize
            ctx_ref[rows, lo:lo + dh] = ctx.astype(jnp.bfloat16)

    # ---- single full-K (K = D) output projection + bias + residual ----
    proj = jnp.dot(ctx_ref[...], wproj_ref[...], preferred_element_type=jnp.float32)
    x = x + proj + bproj_ref[...]

    # ---- norm2 + position-wise feed-forward ----
    h2 = _layernorm(x, ln2g_ref[...], ln2b_ref[...]).astype(jnp.bfloat16)
    f = jnp.dot(h2, wfc1_ref[...], preferred_element_type=jnp.float32) + bfc1_ref[...]
    # exact (erf) GELU in f32, matching torch.nn.functional.gelu default
    f = 0.5 * f * (1.0 + lax.erf(f * jnp.float32(1.0 / math.sqrt(2.0))))
    f = jnp.dot(f.astype(jnp.bfloat16), wfc2_ref[...],
                preferred_element_type=jnp.float32) + bfc2_ref[...]

    o_ref[...] = (x + f).astype(o_ref.dtype)


def _pick_batch_tile(B, S):
    """Batch items per grid step: feed the MXU a fat M while keeping >=2
    parallel grid steps (v7x megacore) when both are achievable."""
    divisors = [d for d in range(1, B + 1) if B % d == 0]
    both = [d for d in divisors if d * S >= 128 and B // d >= 2]
    if both:
        return min(both)
    fat = [d for d in divisors if d * S <= 512]
    return max(fat) if fat else 1


def transformer_block(x, params, num_heads):
    B, S, D = x.shape
    assert D % num_heads == 0
    dh = D // num_heads
    F = params["wfc1"].shape[1]
    bf16 = jnp.bfloat16
    bt = _pick_batch_tile(B, S)
    M = bt * S

    # One-time weight preprocessing (free under jit):
    #  * 1/sqrt(dh) folded into wq AND bq (scale applies to q = xW + b)
    #  * wq/wk/wv fused into one (D, 3D) bf16 slab, biases into (1, 3D)
    #  * all matmul weights cast to bf16; LN params / biases stay f32
    scale = 1.0 / math.sqrt(dh)
    wqkv = jnp.concatenate(
        [params["wq"] * scale, params["wk"], params["wv"]], axis=1).astype(bf16)
    bqkv = jnp.concatenate(
        [params["bq"] * scale, params["bk"], params["bv"]], axis=1)

    kernel_params = [
        params["ln1_g"], params["ln1_b"],
        wqkv, bqkv,
        params["wproj"].astype(bf16), params["bproj"],
        params["ln2_g"], params["ln2_b"],
        params["wfc1"].astype(bf16), params["bfc1"],
        params["wfc2"].astype(bf16), params["bfc2"],
    ]

    def const_spec(shape):
        nd = len(shape)
        # constant-index weights: single-buffered (no pointless double buffer)
        return pl.BlockSpec(shape, lambda i, _nd=nd: (0,) * _nd,
                            pipeline_mode=pl.Buffered(1))

    in_specs = [pl.BlockSpec((M, D), lambda i: (i, 0))]
    in_specs += [const_spec(p.shape) for p in kernel_params]

    kernel = functools.partial(transformer_block_kernel,
                               num_heads=num_heads, seq_len=S)

    flops = int(B * S * (8 * D * D + 4 * D * F) + 4 * B * S * S * D)
    transcendentals = int(B * S * (num_heads * S + F))
    bytes_accessed = int(2 * x.size * x.dtype.itemsize
                         + sum(int(p.size) * p.dtype.itemsize for p in kernel_params))

    # flatten batch into the row (M) dimension so every dense matmul sees
    # M = bt*S instead of M = S; reshape back afterwards (metadata-only).
    x2 = x.reshape(B * S, D)

    out = pl.pallas_call(
        kernel,
        out_shape=jax.ShapeDtypeStruct((B * S, D), x.dtype),
        grid=(B // bt,),
        in_specs=in_specs,
        out_specs=pl.BlockSpec((M, D), lambda i: (i, 0)),
        scratch_shapes=[pltpu.VMEM((M, D), bf16)],
        compiler_params=pltpu.CompilerParams(
            # batch tiles are independent -> shard across TensorCores (v7x)
            dimension_semantics=("parallel",),
            # leave headroom below v7x's 64 MiB physical VMEM
            vmem_limit_bytes=48 * 1024 * 1024,
        ),
        cost_estimate=pl.CostEstimate(
            flops=flops,
            transcendentals=transcendentals,
            bytes_accessed=bytes_accessed,
        ),
    )(x2, *kernel_params)
    return out.reshape(B, S, D)


# ---------------- pure-JAX reference (f32) for validation ----------------
def reference(x, p, num_heads):
    B, S, D = x.shape
    dh = D // num_heads

    def ln(t, g, b):
        mu = jnp.mean(t, axis=-1, keepdims=True)
        var = jnp.mean((t - mu) ** 2, axis=-1, keepdims=True)
        return (t - mu) / jnp.sqrt(var + 1e-6) * g + b

    h = ln(x, p["ln1_g"], p["ln1_b"])
    q = h @ p["wq"] + p["bq"]
    k = h @ p["wk"] + p["bk"]
    v = h @ p["wv"] + p["bv"]
    q = q.reshape(B, S, num_heads, dh).transpose(0, 2, 1, 3)
    k = k.reshape(B, S, num_heads, dh).transpose(0, 2, 1, 3)
    v = v.reshape(B, S, num_heads, dh).transpose(0, 2, 1, 3)
    scores = jnp.einsum("bhqd,bhkd->bhqk", q, k) / math.sqrt(dh)
    probs = jax.nn.softmax(scores, axis=-1)
    attn = jnp.einsum("bhqk,bhkd->bhqd", probs, v)
    attn = attn.transpose(0, 2, 1, 3).reshape(B, S, D)
    h = attn @ p["wproj"] + p["bproj"]
    x = x + h
    h = ln(x, p["ln2_g"], p["ln2_b"])
    h = h @ p["wfc1"] + p["bfc1"]
    h = 0.5 * h * (1.0 + lax.erf(h / math.sqrt(2.0)))
    h = h @ p["wfc2"] + p["bfc2"]
    return x + h


def init_params(key, dim, ff_dim):
    keys = jax.random.split(key, 8)
    s = 0.02
    return {
        "ln1_g": jnp.ones((1, dim), jnp.float32),
        "ln1_b": jnp.zeros((1, dim), jnp.float32),
        "wq": s * jax.random.normal(keys[0], (dim, dim), jnp.float32),
        "bq": jnp.zeros((1, dim), jnp.float32),
        "wk": s * jax.random.normal(keys[1], (dim, dim), jnp.float32),
        "bk": jnp.zeros((1, dim), jnp.float32),
        "wv": s * jax.random.normal(keys[2], (dim, dim), jnp.float32),
        "bv": jnp.zeros((1, dim), jnp.float32),
        "wproj": s * jax.random.normal(keys[3], (dim, dim), jnp.float32),
        "bproj": jnp.zeros((1, dim), jnp.float32),
        "ln2_g": jnp.ones((1, dim), jnp.float32),
        "ln2_b": jnp.zeros((1, dim), jnp.float32),
        "wfc1": s * jax.random.normal(keys[4], (dim, ff_dim), jnp.float32),
        "bfc1": jnp.zeros((1, ff_dim), jnp.float32),
        "wfc2": s * jax.random.normal(keys[5], (ff_dim, dim), jnp.float32),
        "bfc2": jnp.zeros((1, dim), jnp.float32),
    }


if __name__ == "__main__":
    # batch, seq (== tgt_len), dim, heads, ff_dim — lane-dense D (multiple of 128)
    B, S, D, H, F = 2, 16, 128, 4, 256
    key = jax.random.PRNGKey(0)
    kx, kp = jax.random.split(key)
    x = jax.random.normal(kx, (B, S, D), jnp.float32)
    params = init_params(kp, D, F)

    out = transformer_block(x, params, num_heads=H)
    out = jax.block_until_ready(out)

    ref = reference(x, params, num_heads=H)
    assert out.shape == (B, S, D)
    # bf16 MXU operands => ~1e-2 tolerance vs f32 reference
    assert jnp.allclose(out, ref, atol=2e-2, rtol=2e-2), float(jnp.max(jnp.abs(out - ref)))
    print("KERNEL_OK")
</pallas_src>

<mosaic_0001>
module attributes {stable_mosaic.version = 11 : i64} {
  func.func @transformer_block_kernel(%arg0: i32, %arg1: memref<32x128xf32, #tpu.memory_space<vmem>>, %arg2: memref<1x128xf32, #tpu.memory_space<vmem>>, %arg3: memref<1x128xf32, #tpu.memory_space<vmem>>, %arg4: memref<128x384xbf16, #tpu.memory_space<vmem>>, %arg5: memref<1x384xf32, #tpu.memory_space<vmem>>, %arg6: memref<128x128xbf16, #tpu.memory_space<vmem>>, %arg7: memref<1x128xf32, #tpu.memory_space<vmem>>, %arg8: memref<1x128xf32, #tpu.memory_space<vmem>>, %arg9: memref<1x128xf32, #tpu.memory_space<vmem>>, %arg10: memref<128x256xbf16, #tpu.memory_space<vmem>>, %arg11: memref<1x256xf32, #tpu.memory_space<vmem>>, %arg12: memref<256x128xbf16, #tpu.memory_space<vmem>>, %arg13: memref<1x128xf32, #tpu.memory_space<vmem>>, %arg14: memref<32x128xf32, #tpu.memory_space<vmem>>, %arg15: memref<32x128xbf16, #tpu.memory_space<vmem>>) attributes {dimension_semantics = [#tpu.dimension_semantics<parallel>], iteration_bounds = array<i64: 1>, scalar_prefetch = 0 : i64, scratch_operands = 1 : i64, tpu.core_type = #tpu.core_type<tc>, window_params = [{transform_indices = @transform_0, window_bounds = array<i64: 32, 128>}, {pipeline_mode = #tpu.pipeline_mode<synchronous>, transform_indices = @transform_1, window_bounds = array<i64: 1, 128>}, {pipeline_mode = #tpu.pipeline_mode<synchronous>, transform_indices = @transform_2, window_bounds = array<i64: 1, 128>}, {pipeline_mode = #tpu.pipeline_mode<synchronous>, transform_indices = @transform_3, window_bounds = array<i64: 128, 384>}, {pipeline_mode = #tpu.pipeline_mode<synchronous>, transform_indices = @transform_4, window_bounds = array<i64: 1, 384>}, {pipeline_mode = #tpu.pipeline_mode<synchronous>, transform_indices = @transform_5, window_bounds = array<i64: 128, 128>}, {pipeline_mode = #tpu.pipeline_mode<synchronous>, transform_indices = @transform_6, window_bounds = array<i64: 1, 128>}, {pipeline_mode = #tpu.pipeline_mode<synchronous>, transform_indices = @transform_7, window_bounds = array<i64: 1, 128>}, {pipeline_mode = #tpu.pipeline_mode<synchronous>, transform_indices = @transform_8, window_bounds = array<i64: 1, 128>}, {pipeline_mode = #tpu.pipeline_mode<synchronous>, transform_indices = @transform_9, window_bounds = array<i64: 128, 256>}, {pipeline_mode = #tpu.pipeline_mode<synchronous>, transform_indices = @transform_10, window_bounds = array<i64: 1, 256>}, {pipeline_mode = #tpu.pipeline_mode<synchronous>, transform_indices = @transform_11, window_bounds = array<i64: 256, 128>}, {pipeline_mode = #tpu.pipeline_mode<synchronous>, transform_indices = @transform_12, window_bounds = array<i64: 1, 128>}, {transform_indices = @transform_13, window_bounds = array<i64: 32, 128>}]} {
    %c0 = arith.constant 0 : index
    %c0_0 = arith.constant 0 : index
    %0 = vector.load %arg1[%c0, %c0_0] : memref<32x128xf32, #tpu.memory_space<vmem>>, vector<32x128xf32>
    %c0_1 = arith.constant 0 : index
    %c0_2 = arith.constant 0 : index
    %1 = vector.load %arg2[%c0_1, %c0_2] : memref<1x128xf32, #tpu.memory_space<vmem>>, vector<1x128xf32>
    %c0_3 = arith.constant 0 : index
    %c0_4 = arith.constant 0 : index
    %2 = vector.load %arg3[%c0_3, %c0_4] : memref<1x128xf32, #tpu.memory_space<vmem>>, vector<1x128xf32>
    %cst = arith.constant dense<0.000000e+00> : vector<32xf32>
    %3 = vector.multi_reduction <add>, %0, %cst [1] : vector<32x128xf32> to vector<32xf32>
    %4 = vector.shape_cast %3 : vector<32xf32> to vector<32x1xf32>
    %cst_5 = arith.constant 1.280000e+02 : f32
    %5 = vector.broadcast %cst_5 : f32 to vector<32x1xf32>
    %6 = arith.divf %4, %5 : vector<32x1xf32>
    %7 = vector.broadcast %6 : vector<32x1xf32> to vector<32x128xf32>
    %8 = arith.subf %0, %7 : vector<32x128xf32>
    %9 = arith.mulf %8, %8 : vector<32x128xf32>
    %cst_6 = arith.constant dense<0.000000e+00> : vector<32xf32>
    %10 = vector.multi_reduction <add>, %9, %cst_6 [1] : vector<32x128xf32> to vector<32xf32>
    %11 = vector.shape_cast %10 : vector<32xf32> to vector<32x1xf32>
    %cst_7 = arith.constant 1.280000e+02 : f32
    %12 = vector.broadcast %cst_7 : f32 to vector<32x1xf32>
    %13 = arith.divf %11, %12 : vector<32x1xf32>
    %14 = vector.broadcast %6 : vector<32x1xf32> to vector<32x128xf32>
    %15 = arith.subf %0, %14 : vector<32x128xf32>
    %cst_8 = arith.constant 9.99999997E-7 : f32
    %16 = vector.broadcast %cst_8 : f32 to vector<32x1xf32>
    %17 = arith.addf %13, %16 : vector<32x1xf32>
    %18 = math.rsqrt %17 : vector<32x1xf32>
    %19 = vector.broadcast %18 : vector<32x1xf32> to vector<32x128xf32>
    %20 = arith.mulf %15, %19 : vector<32x128xf32>
    %21 = vector.broadcast %1 : vector<1x128xf32> to vector<32x128xf32>
    %22 = arith.mulf %20, %21 : vector<32x128xf32>
    %23 = vector.broadcast %2 : vector<1x128xf32> to vector<32x128xf32>
    %24 = arith.addf %22, %23 : vector<32x128xf32>
    %25 = arith.truncf %24 : vector<32x128xf32> to vector<32x128xbf16>
    %c0_9 = arith.constant 0 : index
    %c0_10 = arith.constant 0 : index
    %26 = vector.load %arg4[%c0_9, %c0_10] : memref<128x384xbf16, #tpu.memory_space<vmem>>, vector<128x384xbf16>
    %cst_11 = arith.constant dense<0.000000e+00> : vector<32x384xf32>
    %27 = tpu.matmul %25, %26, %cst_11 {dimension_numbers = #tpu.dot_dimension_numbers<[1], [0], [0], [1], [0, 0, 1, 1], [], []>} : vector<32x128xbf16>, vector<128x384xbf16>, vector<32x384xf32> -> vector<32x384xf32>
    %c0_12 = arith.constant 0 : index
    %c0_13 = arith.constant 0 : index
    %28 = vector.load %arg5[%c0_12, %c0_13] : memref<1x384xf32, #tpu.memory_space<vmem>>, vector<1x384xf32>
    %29 = vector.broadcast %28 : vector<1x384xf32> to vector<32x384xf32>
    %30 = arith.addf %27, %29 : vector<32x384xf32>
    %31 = arith.truncf %30 : vector<32x384xf32> to vector<32x384xbf16>
    %32 = vector.extract_strided_slice %31 {offsets = [0, 0], sizes = [16, 32], strides = [1, 1]} : vector<32x384xbf16> to vector<16x32xbf16>
    %33 = vector.extract_strided_slice %31 {offsets = [0, 128], sizes = [16, 32], strides = [1, 1]} : vector<32x384xbf16> to vector<16x32xbf16>
    %34 = vector.extract_strided_slice %31 {offsets = [0, 256], sizes = [16, 32], strides = [1, 1]} : vector<32x384xbf16> to vector<16x32xbf16>
    %cst_14 = arith.constant dense<0.000000e+00> : vector<16x16xf32>
    %35 = tpu.matmul %32, %33, %cst_14 {dimension_numbers = #tpu.dot_dimension_numbers<[1], [1], [0], [0], [0, 0, 1, 0], [], []>} : vector<16x32xbf16>, vector<16x32xbf16>, vector<16x16xf32> -> vector<16x16xf32>
    %cst_15 = arith.constant dense<0xFF800000> : vector<16xf32>
    %36 = vector.multi_reduction <maximumf>, %35, %cst_15 [1] : vector<16x16xf32> to vector<16xf32>
    %37 = vector.shape_cast %36 : vector<16xf32> to vector<16x1xf32>
    %38 = vector.broadcast %37 : vector<16x1xf32> to vector<16x16xf32>
    %39 = arith.subf %35, %38 : vector<16x16xf32>
    %40 = math.exp %39 : vector<16x16xf32>
    %cst_16 = arith.constant dense<0.000000e+00> : vector<16xf32>
    %41 = vector.multi_reduction <add>, %40, %cst_16 [1] : vector<16x16xf32> to vector<16xf32>
    %42 = vector.shape_cast %41 : vector<16xf32> to vector<16x1xf32>
    %43 = arith.truncf %40 : vector<16x16xf32> to vector<16x16xbf16>
    %cst_17 = arith.constant dense<0.000000e+00> : vector<16x32xf32>
    %44 = tpu.matmul %43, %34, %cst_17 {dimension_numbers = #tpu.dot_dimension_numbers<[1], [0], [0], [1], [0, 0, 1, 1], [], []>} : vector<16x16xbf16>, vector<16x32xbf16>, vector<16x32xf32> -> vector<16x32xf32>
    %45 = vector.broadcast %42 : vector<16x1xf32> to vector<16x32xf32>
    %46 = arith.divf %44, %45 : vector<16x32xf32>
    %47 = arith.truncf %46 : vector<16x32xf32> to vector<16x32xbf16>
    %c0_18 = arith.constant 0 : index
    %c0_19 = arith.constant 0 : index
    %48 = vector.load %arg15[%c0_18, %c0_19] : memref<32x128xbf16, #tpu.memory_space<vmem>>, vector<16x32xbf16>
    tpu.vector_store %arg15[%c0_18, %c0_19], %47 {strides = array<i32>} : memref<32x128xbf16, #tpu.memory_space<vmem>>, vector<16x32xbf16>,
    %49 = vector.extract_strided_slice %31 {offsets = [0, 32], sizes = [16, 32], strides = [1, 1]} : vector<32x384xbf16> to vector<16x32xbf16>
    %50 = vector.extract_strided_slice %31 {offsets = [0, 160], sizes = [16, 32], strides = [1, 1]} : vector<32x384xbf16> to vector<16x32xbf16>
    %51 = vector.extract_strided_slice %31 {offsets = [0, 288], sizes = [16, 32], strides = [1, 1]} : vector<32x384xbf16> to vector<16x32xbf16>
    %cst_20 = arith.constant dense<0.000000e+00> : vector<16x16xf32>
    %52 = tpu.matmul %49, %50, %cst_20 {dimension_numbers = #tpu.dot_dimension_numbers<[1], [1], [0], [0], [0, 0, 1, 0], [], []>} : vector<16x32xbf16>, vector<16x32xbf16>, vector<16x16xf32> -> vector<16x16xf32>
    %cst_21 = arith.constant dense<0xFF800000> : vector<16xf32>
    %53 = vector.multi_reduction <maximumf>, %52, %cst_21 [1] : vector<16x16xf32> to vector<16xf32>
    %54 = vector.shape_cast %53 : vector<16xf32> to vector<16x1xf32>
    %55 = vector.broadcast %54 : vector<16x1xf32> to vector<16x16xf32>
    %56 = arith.subf %52, %55 : vector<16x16xf32>
    %57 = math.exp %56 : vector<16x16xf32>
    %cst_22 = arith.constant dense<0.000000e+00> : vector<16xf32>
    %58 = vector.multi_reduction <add>, %57, %cst_22 [1] : vector<16x16xf32> to vector<16xf32>
    %59 = vector.shape_cast %58 : vector<16xf32> to vector<16x1xf32>
    %60 = arith.truncf %57 : vector<16x16xf32> to vector<16x16xbf16>
    %cst_23 = arith.constant dense<0.000000e+00> : vector<16x32xf32>
    %61 = tpu.matmul %60, %51, %cst_23 {dimension_numbers = #tpu.dot_dimension_numbers<[1], [0], [0], [1], [0, 0, 1, 1], [], []>} : vector<16x16xbf16>, vector<16x32xbf16>, vector<16x32xf32> -> vector<16x32xf32>
    %62 = vector.broadcast %59 : vector<16x1xf32> to vector<16x32xf32>
    %63 = arith.divf %61, %62 : vector<16x32xf32>
    %64 = arith.truncf %63 : vector<16x32xf32> to vector<16x32xbf16>
    %c0_24 = arith.constant 0 : index
    %c32 = arith.constant 32 : index
    %65 = vector.load %arg15[%c0_24, %c32] : memref<32x128xbf16, #tpu.memory_space<vmem>>, vector<16x32xbf16>
    tpu.vector_store %arg15[%c0_24, %c32], %64 {strides = array<i32>} : memref<32x128xbf16, #tpu.memory_space<vmem>>, vector<16x32xbf16>,
    %66 = vector.extract_strided_slice %31 {offsets = [0, 64], sizes = [16, 32], strides = [1, 1]} : vector<32x384xbf16> to vector<16x32xbf16>
    %67 = vector.extract_strided_slice %31 {offsets = [0, 192], sizes = [16, 32], strides = [1, 1]} : vector<32x384xbf16> to vector<16x32xbf16>
    %68 = vector.extract_strided_slice %31 {offsets = [0, 320], sizes = [16, 32], strides = [1, 1]} : vector<32x384xbf16> to vector<16x32xbf16>
    %cst_25 = arith.constant dense<0.000000e+00> : vector<16x16xf32>
    %69 = tpu.matmul %66, %67, %cst_25 {dimension_numbers = #tpu.dot_dimension_numbers<[1], [1], [0], [0], [0, 0, 1, 0], [], []>} : vector<16x32xbf16>, vector<16x32xbf16>, vector<16x16xf32> -> vector<16x16xf32>
    %cst_26 = arith.constant dense<0xFF800000> : vector<16xf32>
    %70 = vector.multi_reduction <maximumf>, %69, %cst_26 [1] : vector<16x16xf32> to vector<16xf32>
    %71 = vector.shape_cast %70 : vector<16xf32> to vector<16x1xf32>
    %72 = vector.broadcast %71 : vector<16x1xf32> to vector<16x16xf32>
    %73 = arith.subf %69, %72 : vector<16x16xf32>
    %74 = math.exp %73 : vector<16x16xf32>
    %cst_27 = arith.constant dense<0.000000e+00> : vector<16xf32>
    %75 = vector.multi_reduction <add>, %74, %cst_27 [1] : vector<16x16xf32> to vector<16xf32>
    %76 = vector.shape_cast %75 : vector<16xf32> to vector<16x1xf32>
    %77 = arith.truncf %74 : vector<16x16xf32> to vector<16x16xbf16>
    %cst_28 = arith.constant dense<0.000000e+00> : vector<16x32xf32>
    %78 = tpu.matmul %77, %68, %cst_28 {dimension_numbers = #tpu.dot_dimension_numbers<[1], [0], [0], [1], [0, 0, 1, 1], [], []>} : vector<16x16xbf16>, vector<16x32xbf16>, vector<16x32xf32> -> vector<16x32xf32>
    %79 = vector.broadcast %76 : vector<16x1xf32> to vector<16x32xf32>
    %80 = arith.divf %78, %79 : vector<16x32xf32>
    %81 = arith.truncf %80 : vector<16x32xf32> to vector<16x32xbf16>
    %c0_29 = arith.constant 0 : index
    %c64 = arith.constant 64 : index
    %82 = vector.load %arg15[%c0_29, %c64] : memref<32x128xbf16, #tpu.memory_space<vmem>>, vector<16x32xbf16>
    tpu.vector_store %arg15[%c0_29, %c64], %81 {strides = array<i32>} : memref<32x128xbf16, #tpu.memory_space<vmem>>, vector<16x32xbf16>,
    %83 = vector.extract_strided_slice %31 {offsets = [0, 96], sizes = [16, 32], strides = [1, 1]} : vector<32x384xbf16> to vector<16x32xbf16>
    %84 = vector.extract_strided_slice %31 {offsets = [0, 224], sizes = [16, 32], strides = [1, 1]} : vector<32x384xbf16> to vector<16x32xbf16>
    %85 = vector.extract_strided_slice %31 {offsets = [0, 352], sizes = [16, 32], strides = [1, 1]} : vector<32x384xbf16> to vector<16x32xbf16>
    %cst_30 = arith.constant dense<0.000000e+00> : vector<16x16xf32>
    %86 = tpu.matmul %83, %84, %cst_30 {dimension_numbers = #tpu.dot_dimension_numbers<[1], [1], [0], [0], [0, 0, 1, 0], [], []>} : vector<16x32xbf16>, vector<16x32xbf16>, vector<16x16xf32> -> vector<16x16xf32>
    %cst_31 = arith.constant dense<0xFF800000> : vector<16xf32>
    %87 = vector.multi_reduction <maximumf>, %86, %cst_31 [1] : vector<16x16xf32> to vector<16xf32>
    %88 = vector.shape_cast %87 : vector<16xf32> to vector<16x1xf32>
    %89 = vector.broadcast %88 : vector<16x1xf32> to vector<16x16xf32>
    %90 = arith.subf %86, %89 : vector<16x16xf32>
    %91 = math.exp %90 : vector<16x16xf32>
    %cst_32 = arith.constant dense<0.000000e+00> : vector<16xf32>
    %92 = vector.multi_reduction <add>, %91, %cst_32 [1] : vector<16x16xf32> to vector<16xf32>
    %93 = vector.shape_cast %92 : vector<16xf32> to vector<16x1xf32>
    %94 = arith.truncf %91 : vector<16x16xf32> to vector<16x16xbf16>
    %cst_33 = arith.constant dense<0.000000e+00> : vector<16x32xf32>
    %95 = tpu.matmul %94, %85, %cst_33 {dimension_numbers = #tpu.dot_dimension_numbers<[1], [0], [0], [1], [0, 0, 1, 1], [], []>} : vector<16x16xbf16>, vector<16x32xbf16>, vector<16x32xf32> -> vector<16x32xf32>
    %96 = vector.broadcast %93 : vector<16x1xf32> to vector<16x32xf32>
    %97 = arith.divf %95, %96 : vector<16x32xf32>
    %98 = arith.truncf %97 : vector<16x32xf32> to vector<16x32xbf16>
    %c0_34 = arith.constant 0 : index
    %c96 = arith.constant 96 : index
    %99 = vector.load %arg15[%c0_34, %c96] : memref<32x128xbf16, #tpu.memory_space<vmem>>, vector<16x32xbf16>
    tpu.vector_store %arg15[%c0_34, %c96], %98 {strides = array<i32>} : memref<32x128xbf16, #tpu.memory_space<vmem>>, vector<16x32xbf16>,
    %100 = vector.extract_strided_slice %31 {offsets = [16, 0], sizes = [16, 32], strides = [1, 1]} : vector<32x384xbf16> to vector<16x32xbf16>
    %101 = vector.extract_strided_slice %31 {offsets = [16, 128], sizes = [16, 32], strides = [1, 1]} : vector<32x384xbf16> to vector<16x32xbf16>
    %102 = vector.extract_strided_slice %31 {offsets = [16, 256], sizes = [16, 32], strides = [1, 1]} : vector<32x384xbf16> to vector<16x32xbf16>
    %cst_35 = arith.constant dense<0.000000e+00> : vector<16x16xf32>
    %103 = tpu.matmul %100, %101, %cst_35 {dimension_numbers = #tpu.dot_dimension_numbers<[1], [1], [0], [0], [0, 0, 1, 0], [], []>} : vector<16x32xbf16>, vector<16x32xbf16>, vector<16x16xf32> -> vector<16x16xf32>
    %cst_36 = arith.constant dense<0xFF800000> : vector<16xf32>
    %104 = vector.multi_reduction <maximumf>, %103, %cst_36 [1] : vector<16x16xf32> to vector<16xf32>
    %105 = vector.shape_cast %104 : vector<16xf32> to vector<16x1xf32>
    %106 = vector.broadcast %105 : vector<16x1xf32> to vector<16x16xf32>
    %107 = arith.subf %103, %106 : vector<16x16xf32>
    %108 = math.exp %107 : vector<16x16xf32>
    %cst_37 = arith.constant dense<0.000000e+00> : vector<16xf32>
    %109 = vector.multi_reduction <add>, %108, %cst_37 [1] : vector<16x16xf32> to vector<16xf32>
    %110 = vector.shape_cast %109 : vector<16xf32> to vector<16x1xf32>
    %111 = arith.truncf %108 : vector<16x16xf32> to vector<16x16xbf16>
    %cst_38 = arith.constant dense<0.000000e+00> : vector<16x32xf32>
    %112 = tpu.matmul %111, %102, %cst_38 {dimension_numbers = #tpu.dot_dimension_numbers<[1], [0], [0], [1], [0, 0, 1, 1], [], []>} : vector<16x16xbf16>, vector<16x32xbf16>, vector<16x32xf32> -> vector<16x32xf32>
    %113 = vector.broadcast %110 : vector<16x1xf32> to vector<16x32xf32>
    %114 = arith.divf %112, %113 : vector<16x32xf32>
    %115 = arith.truncf %114 : vector<16x32xf32> to vector<16x32xbf16>
    %c16 = arith.constant 16 : index
    %c0_39 = arith.constant 0 : index
    %116 = vector.load %arg15[%c16, %c0_39] : memref<32x128xbf16, #tpu.memory_space<vmem>>, vector<16x32xbf16>
    tpu.vector_store %arg15[%c16, %c0_39], %115 {strides = array<i32>} : memref<32x128xbf16, #tpu.memory_space<vmem>>, vector<16x32xbf16>,
    %117 = vector.extract_strided_slice %31 {offsets = [16, 32], sizes = [16, 32], strides = [1, 1]} : vector<32x384xbf16> to vector<16x32xbf16>
    %118 = vector.extract_strided_slice %31 {offsets = [16, 160], sizes = [16, 32], strides = [1, 1]} : vector<32x384xbf16> to vector<16x32xbf16>
    %119 = vector.extract_strided_slice %31 {offsets = [16, 288], sizes = [16, 32], strides = [1, 1]} : vector<32x384xbf16> to vector<16x32xbf16>
    %cst_40 = arith.constant dense<0.000000e+00> : vector<16x16xf32>
    %120 = tpu.matmul %117, %118, %cst_40 {dimension_numbers = #tpu.dot_dimension_numbers<[1], [1], [0], [0], [0, 0, 1, 0], [], []>} : vector<16x32xbf16>, vector<16x32xbf16>, vector<16x16xf32> -> vector<16x16xf32>
    %cst_41 = arith.constant dense<0xFF800000> : vector<16xf32>
    %121 = vector.multi_reduction <maximumf>, %120, %cst_41 [1] : vector<16x16xf32> to vector<16xf32>
    %122 = vector.shape_cast %121 : vector<16xf32> to vector<16x1xf32>
    %123 = vector.broadcast %122 : vector<16x1xf32> to vector<16x16xf32>
    %124 = arith.subf %120, %123 : vector<16x16xf32>
    %125 = math.exp %124 : vector<16x16xf32>
    %cst_42 = arith.constant dense<0.000000e+00> : vector<16xf32>
    %126 = vector.multi_reduction <add>, %125, %cst_42 [1] : vector<16x16xf32> to vector<16xf32>
    %127 = vector.shape_cast %126 : vector<16xf32> to vector<16x1xf32>
    %128 = arith.truncf %125 : vector<16x16xf32> to vector<16x16xbf16>
    %cst_43 = arith.constant dense<0.000000e+00> : vector<16x32xf32>
    %129 = tpu.matmul %128, %119, %cst_43 {dimension_numbers = #tpu.dot_dimension_numbers<[1], [0], [0], [1], [0, 0, 1, 1], [], []>} : vector<16x16xbf16>, vector<16x32xbf16>, vector<16x32xf32> -> vector<16x32xf32>
    %130 = vector.broadcast %127 : vector<16x1xf32> to vector<16x32xf32>
    %131 = arith.divf %129, %130 : vector<16x32xf32>
    %132 = arith.truncf %131 : vector<16x32xf32> to vector<16x32xbf16>
    %c16_44 = arith.constant 16 : index
    %c32_45 = arith.constant 32 : index
    %133 = vector.load %arg15[%c16_44, %c32_45] : memref<32x128xbf16, #tpu.memory_space<vmem>>, vector<16x32xbf16>
    tpu.vector_store %arg15[%c16_44, %c32_45], %132 {strides = array<i32>} : memref<32x128xbf16, #tpu.memory_space<vmem>>, vector<16x32xbf16>,
    %134 = vector.extract_strided_slice %31 {offsets = [16, 64], sizes = [16, 32], strides = [1, 1]} : vector<32x384xbf16> to vector<16x32xbf16>
    %135 = vector.extract_strided_slice %31 {offsets = [16, 192], sizes = [16, 32], strides = [1, 1]} : vector<32x384xbf16> to vector<16x32xbf16>
    %136 = vector.extract_strided_slice %31 {offsets = [16, 320], sizes = [16, 32], strides = [1, 1]} : vector<32x384xbf16> to vector<16x32xbf16>
    %cst_46 = arith.constant dense<0.000000e+00> : vector<16x16xf32>
    %137 = tpu.matmul %134, %135, %cst_46 {dimension_numbers = #tpu.dot_dimension_numbers<[1], [1], [0], [0], [0, 0, 1, 0], [], []>} : vector<16x32xbf16>, vector<16x32xbf16>, vector<16x16xf32> -> vector<16x16xf32>
    %cst_47 = arith.constant dense<0xFF800000> : vector<16xf32>
    %138 = vector.multi_reduction <maximumf>, %137, %cst_47 [1] : vector<16x16xf32> to vector<16xf32>
    %139 = vector.shape_cast %138 : vector<16xf32> to vector<16x1xf32>
    %140 = vector.broadcast %139 : vector<16x1xf32> to vector<16x16xf32>
    %141 = arith.subf %137, %140 : vector<16x16xf32>
    %142 = math.exp %141 : vector<16x16xf32>
    %cst_48 = arith.constant dense<0.000000e+00> : vector<16xf32>
    %143 = vector.multi_reduction <add>, %142, %cst_48 [1] : vector<16x16xf32> to vector<16xf32>
    %144 = vector.shape_cast %143 : vector<16xf32> to vector<16x1xf32>
    %145 = arith.truncf %142 : vector<16x16xf32> to vector<16x16xbf16>
    %cst_49 = arith.constant dense<0.000000e+00> : vector<16x32xf32>
    %146 = tpu.matmul %145, %136, %cst_49 {dimension_numbers = #tpu.dot_dimension_numbers<[1], [0], [0], [1], [0, 0, 1, 1], [], []>} : vector<16x16xbf16>, vector<16x32xbf16>, vector<16x32xf32> -> vector<16x32xf32>
    %147 = vector.broadcast %144 : vector<16x1xf32> to vector<16x32xf32>
    %148 = arith.divf %146, %147 : vector<16x32xf32>
    %149 = arith.truncf %148 : vector<16x32xf32> to vector<16x32xbf16>
    %c16_50 = arith.constant 16 : index
    %c64_51 = arith.constant 64 : index
    %150 = vector.load %arg15[%c16_50, %c64_51] : memref<32x128xbf16, #tpu.memory_space<vmem>>, vector<16x32xbf16>
    tpu.vector_store %arg15[%c16_50, %c64_51], %149 {strides = array<i32>} : memref<32x128xbf16, #tpu.memory_space<vmem>>, vector<16x32xbf16>,
    %151 = vector.extract_strided_slice %31 {offsets = [16, 96], sizes = [16, 32], strides = [1, 1]} : vector<32x384xbf16> to vector<16x32xbf16>
    %152 = vector.extract_strided_slice %31 {offsets = [16, 224], sizes = [16, 32], strides = [1, 1]} : vector<32x384xbf16> to vector<16x32xbf16>
    %153 = vector.extract_strided_slice %31 {offsets = [16, 352], sizes = [16, 32], strides = [1, 1]} : vector<32x384xbf16> to vector<16x32xbf16>
    %cst_52 = arith.constant dense<0.000000e+00> : vector<16x16xf32>
    %154 = tpu.matmul %151, %152, %cst_52 {dimension_numbers = #tpu.dot_dimension_numbers<[1], [1], [0], [0], [0, 0, 1, 0], [], []>} : vector<16x32xbf16>, vector<16x32xbf16>, vector<16x16xf32> -> vector<16x16xf32>
    %cst_53 = arith.constant dense<0xFF800000> : vector<16xf32>
    %155 = vector.multi_reduction <maximumf>, %154, %cst_53 [1] : vector<16x16xf32> to vector<16xf32>
    %156 = vector.shape_cast %155 : vector<16xf32> to vector<16x1xf32>
    %157 = vector.broadcast %156 : vector<16x1xf32> to vector<16x16xf32>
    %158 = arith.subf %154, %157 : vector<16x16xf32>
    %159 = math.exp %158 : vector<16x16xf32>
    %cst_54 = arith.constant dense<0.000000e+00> : vector<16xf32>
    %160 = vector.multi_reduction <add>, %159, %cst_54 [1] : vector<16x16xf32> to vector<16xf32>
    %161 = vector.shape_cast %160 : vector<16xf32> to vector<16x1xf32>
    %162 = arith.truncf %159 : vector<16x16xf32> to vector<16x16xbf16>
    %cst_55 = arith.constant dense<0.000000e+00> : vector<16x32xf32>
    %163 = tpu.matmul %162, %153, %cst_55 {dimension_numbers = #tpu.dot_dimension_numbers<[1], [0], [0], [1], [0, 0, 1, 1], [], []>} : vector<16x16xbf16>, vector<16x32xbf16>, vector<16x32xf32> -> vector<16x32xf32>
    %164 = vector.broadcast %161 : vector<16x1xf32> to vector<16x32xf32>
    %165 = arith.divf %163, %164 : vector<16x32xf32>
    %166 = arith.truncf %165 : vector<16x32xf32> to vector<16x32xbf16>
    %c16_56 = arith.constant 16 : index
    %c96_57 = arith.constant 96 : index
    %167 = vector.load %arg15[%c16_56, %c96_57] : memref<32x128xbf16, #tpu.memory_space<vmem>>, vector<16x32xbf16>
    tpu.vector_store %arg15[%c16_56, %c96_57], %166 {strides = array<i32>} : memref<32x128xbf16, #tpu.memory_space<vmem>>, vector<16x32xbf16>,
    %c0_58 = arith.constant 0 : index
    %c0_59 = arith.constant 0 : index
    %168 = vector.load %arg15[%c0_58, %c0_59] : memref<32x128xbf16, #tpu.memory_space<vmem>>, vector<32x128xbf16>
    %c0_60 = arith.constant 0 : index
    %c0_61 = arith.constant 0 : index
    %169 = vector.load %arg6[%c0_60, %c0_61] : memref<128x128xbf16, #tpu.memory_space<vmem>>, vector<128x128xbf16>
    %cst_62 = arith.constant dense<0.000000e+00> : vector<32x128xf32>
    %170 = tpu.matmul %168, %169, %cst_62 {dimension_numbers = #tpu.dot_dimension_numbers<[1], [0], [0], [1], [0, 0, 1, 1], [], []>} : vector<32x128xbf16>, vector<128x128xbf16>, vector<32x128xf32> -> vector<32x128xf32>
    %171 = arith.addf %0, %170 : vector<32x128xf32>
    %c0_63 = arith.constant 0 : index
    %c0_64 = arith.constant 0 : index
    %172 = vector.load %arg7[%c0_63, %c0_64] : memref<1x128xf32, #tpu.memory_space<vmem>>, vector<1x128xf32>
    %173 = vector.broadcast %172 : vector<1x128xf32> to vector<32x128xf32>
    %174 = arith.addf %171, %173 : vector<32x128xf32>
    %c0_65 = arith.constant 0 : index
    %c0_66 = arith.constant 0 : index
    %175 = vector.load %arg8[%c0_65, %c0_66] : memref<1x128xf32, #tpu.memory_space<vmem>>, vector<1x128xf32>
    %c0_67 = arith.constant 0 : index
    %c0_68 = arith.constant 0 : index
    %176 = vector.load %arg9[%c0_67, %c0_68] : memref<1x128xf32, #tpu.memory_space<vmem>>, vector<1x128xf32>
    %cst_69 = arith.constant dense<0.000000e+00> : vector<32xf32>
    %177 = vector.multi_reduction <add>, %174, %cst_69 [1] : vector<32x128xf32> to vector<32xf32>
    %178 = vector.shape_cast %177 : vector<32xf32> to vector<32x1xf32>
    %cst_70 = arith.constant 1.280000e+02 : f32
    %179 = vector.broadcast %cst_70 : f32 to vector<32x1xf32>
    %180 = arith.divf %178, %179 : vector<32x1xf32>
    %181 = vector.broadcast %180 : vector<32x1xf32> to vector<32x128xf32>
    %182 = arith.subf %174, %181 : vector<32x128xf32>
    %183 = arith.mulf %182, %182 : vector<32x128xf32>
    %cst_71 = arith.constant dense<0.000000e+00> : vector<32xf32>
    %184 = vector.multi_reduction <add>, %183, %cst_71 [1] : vector<32x128xf32> to vector<32xf32>
    %185 = vector.shape_cast %184 : vector<32xf32> to vector<32x1xf32>
    %cst_72 = arith.constant 1.280000e+02 : f32
    %186 = vector.broadcast %cst_72 : f32 to vector<32x1xf32>
    %187 = arith.divf %185, %186 : vector<32x1xf32>
    %188 = vector.broadcast %180 : vector<32x1xf32> to vector<32x128xf32>
    %189 = arith.subf %174, %188 : vector<32x128xf32>
    %cst_73 = arith.constant 9.99999997E-7 : f32
    %190 = vector.broadcast %cst_73 : f32 to vector<32x1xf32>
    %191 = arith.addf %187, %190 : vector<32x1xf32>
    %192 = math.rsqrt %191 : vector<32x1xf32>
    %193 = vector.broadcast %192 : vector<32x1xf32> to vector<32x128xf32>
    %194 = arith.mulf %189, %193 : vector<32x128xf32>
    %195 = vector.broadcast %175 : vector<1x128xf32> to vector<32x128xf32>
    %196 = arith.mulf %194, %195 : vector<32x128xf32>
    %197 = vector.broadcast %176 : vector<1x128xf32> to vector<32x128xf32>
    %198 = arith.addf %196, %197 : vector<32x128xf32>
    %199 = arith.truncf %198 : vector<32x128xf32> to vector<32x128xbf16>
    %c0_74 = arith.constant 0 : index
    %c0_75 = arith.constant 0 : index
    %200 = vector.load %arg10[%c0_74, %c0_75] : memref<128x256xbf16, #tpu.memory_space<vmem>>, vector<128x256xbf16>
    %cst_76 = arith.constant dense<0.000000e+00> : vector<32x256xf32>
    %201 = tpu.matmul %199, %200, %cst_76 {dimension_numbers = #tpu.dot_dimension_numbers<[1], [0], [0], [1], [0, 0, 1, 1], [], []>} : vector<32x128xbf16>, vector<128x256xbf16>, vector<32x256xf32> -> vector<32x256xf32>
    %c0_77 = arith.constant 0 : index
    %c0_78 = arith.constant 0 : index
    %202 = vector.load %arg11[%c0_77, %c0_78] : memref<1x256xf32, #tpu.memory_space<vmem>>, vector<1x256xf32>
    %203 = vector.broadcast %202 : vector<1x256xf32> to vector<32x256xf32>
    %204 = arith.addf %201, %203 : vector<32x256xf32>
    %cst_79 = arith.constant 5.000000e-01 : f32
    %205 = vector.broadcast %cst_79 : f32 to vector<32x256xf32>
    %206 = arith.mulf %205, %204 : vector<32x256xf32>
    %cst_80 = arith.constant 0.707106769 : f32
    %207 = vector.broadcast %cst_80 : f32 to vector<32x256xf32>
    %208 = arith.mulf %204, %207 : vector<32x256xf32>
    %209 = math.erf %208 : vector<32x256xf32>
    %cst_81 = arith.constant 1.000000e+00 : f32
    %210 = vector.broadcast %cst_81 : f32 to vector<32x256xf32>
    %211 = arith.addf %210, %209 : vector<32x256xf32>
    %212 = arith.mulf %206, %211 : vector<32x256xf32>
    %213 = arith.truncf %212 : vector<32x256xf32> to vector<32x256xbf16>
    %c0_82 = arith.constant 0 : index
    %c0_83 = arith.constant 0 : index
    %214 = vector.load %arg12[%c0_82, %c0_83] : memref<256x128xbf16, #tpu.memory_space<vmem>>, vector<256x128xbf16>
    %cst_84 = arith.constant dense<0.000000e+00> : vector<32x128xf32>
    %215 = tpu.matmul %213, %214, %cst_84 {dimension_numbers = #tpu.dot_dimension_numbers<[1], [0], [0], [1], [0, 0, 1, 1], [], []>} : vector<32x256xbf16>, vector<256x128xbf16>, vector<32x128xf32> -> vector<32x128xf32>
    %c0_85 = arith.constant 0 : index
    %c0_86 = arith.constant 0 : index
    %216 = vector.load %arg13[%c0_85, %c0_86] : memref<1x128xf32, #tpu.memory_space<vmem>>, vector<1x128xf32>
    %217 = vector.broadcast %216 : vector<1x128xf32> to vector<32x128xf32>
    %218 = arith.addf %215, %217 : vector<32x128xf32>
    %219 = arith.addf %174, %218 : vector<32x128xf32>
    %c0_87 = arith.constant 0 : index
    %c0_88 = arith.constant 0 : index
    %220 = vector.load %arg14[%c0_87, %c0_88] : memref<32x128xf32, #tpu.memory_space<vmem>>, vector<32x128xf32>
    tpu.vector_store %arg14[%c0_87, %c0_88], %219 {strides = array<i32>} : memref<32x128xf32, #tpu.memory_space<vmem>>, vector<32x128xf32>,
    return
  }
  func.func @transform_0(%arg0: i32) -> (i32, i32) {
    %c0_i32 = arith.constant 0 : i32
    %c0_i32_0 = arith.constant 0 : i32
    return %arg0, %c0_i32 : i32, i32
  }
  func.func @transform_1(%arg0: i32) -> (i32, i32) {
    %c0_i32 = arith.constant 0 : i32
    %c0_i32_0 = arith.constant 0 : i32
    %c0_i32_1 = arith.constant 0 : i32
    return %c0_i32, %c0_i32_0 : i32, i32
  }
  func.func @transform_2(%arg0: i32) -> (i32, i32) {
    %c0_i32 = arith.constant 0 : i32
    %c0_i32_0 = arith.constant 0 : i32
    %c0_i32_1 = arith.constant 0 : i32
    return %c0_i32, %c0_i32_0 : i32, i32
  }
  func.func @transform_3(%arg0: i32) -> (i32, i32) {
    %c0_i32 = arith.constant 0 : i32
    %c0_i32_0 = arith.constant 0 : i32
    %c0_i32_1 = arith.constant 0 : i32
    return %c0_i32, %c0_i32_0 : i32, i32
  }
  func.func @transform_4(%arg0: i32) -> (i32, i32) {
    %c0_i32 = arith.constant 0 : i32
    %c0_i32_0 = arith.constant 0 : i32
    %c0_i32_1 = arith.constant 0 : i32
    return %c0_i32, %c0_i32_0 : i32, i32
  }
  func.func @transform_5(%arg0: i32) -> (i32, i32) {
    %c0_i32 = arith.constant 0 : i32
    %c0_i32_0 = arith.constant 0 : i32
    %c0_i32_1 = arith.constant 0 : i32
    return %c0_i32, %c0_i32_0 : i32, i32
  }
  func.func @transform_6(%arg0: i32) -> (i32, i32) {
    %c0_i32 = arith.constant 0 : i32
    %c0_i32_0 = arith.constant 0 : i32
    %c0_i32_1 = arith.constant 0 : i32
    return %c0_i32, %c0_i32_0 : i32, i32
  }
  func.func @transform_7(%arg0: i32) -> (i32, i32) {
    %c0_i32 = arith.constant 0 : i32
    %c0_i32_0 = arith.constant 0 : i32
    %c0_i32_1 = arith.constant 0 : i32
    return %c0_i32, %c0_i32_0 : i32, i32
  }
  func.func @transform_8(%arg0: i32) -> (i32, i32) {
    %c0_i32 = arith.constant 0 : i32
    %c0_i32_0 = arith.constant 0 : i32
    %c0_i32_1 = arith.constant 0 : i32
    return %c0_i32, %c0_i32_0 : i32, i32
  }
  func.func @transform_9(%arg0: i32) -> (i32, i32) {
    %c0_i32 = arith.constant 0 : i32
    %c0_i32_0 = arith.constant 0 : i32
    %c0_i32_1 = arith.constant 0 : i32
    return %c0_i32, %c0_i32_0 : i32, i32
  }
  func.func @transform_10(%arg0: i32) -> (i32, i32) {
    %c0_i32 = arith.constant 0 : i32
    %c0_i32_0 = arith.constant 0 : i32
    %c0_i32_1 = arith.constant 0 : i32
    return %c0_i32, %c0_i32_0 : i32, i32
  }
  func.func @transform_11(%arg0: i32) -> (i32, i32) {
    %c0_i32 = arith.constant 0 : i32
    %c0_i32_0 = arith.constant 0 : i32
    %c0_i32_1 = arith.constant 0 : i32
    return %c0_i32, %c0_i32_0 : i32, i32
  }
  func.func @transform_12(%arg0: i32) -> (i32, i32) {
    %c0_i32 = arith.constant 0 : i32
    %c0_i32_0 = arith.constant 0 : i32
    %c0_i32_1 = arith.constant 0 : i32
    return %c0_i32, %c0_i32_0 : i32, i32
  }
  func.func @transform_13(%arg0: i32) -> (i32, i32) {
    %c0_i32 = arith.constant 0 : i32
    %c0_i32_0 = arith.constant 0 : i32
    return %arg0, %c0_i32 : i32, i32
  }
}

</mosaic_0001>

<bundles_post_ra>
// kernel: tpu_custom_call.1
= control target key start
LH: loop header
LB: loop body
LE: loop exit
PB: predicated region body
PF: predicated region fallthrough
CT: control target
= control target key end

     0   :  { %18 = vsyncpa [#allocation4], 0  ;;  %s3231_s0 = inlined_call_operand.hbm [shape: f32[32,128], index: 0, kind: input, shape index: {}]   ;;  %s3232_s1 = inlined_call_operand.vmem [shape: f32[1,128], index: 1, kind: input, shape index: {}]   ;;  %s3233_s2 = inlined_call_operand.vmem [shape: f32[1,128], index: 2, kind: input, shape index: {}]   ;;  %s3234_s3 = inlined_call_operand.hbm [shape: bf16[128,384], index: 3, kind: input, shape index: {}]   ;;  %s3235_s4 = inlined_call_operand.vmem [shape: f32[1,384], index: 4, kind: input, shape index: {}]   ;;  %s3236_s5 = inlined_call_operand.hbm [shape: bf16[128,128], index: 5, kind: input, shape index: {}]   ;;  %s3237_s6 = inlined_call_operand.vmem [shape: f32[1,128], index: 6, kind: input, shape index: {}]   ;;  %s3238_s7 = inlined_call_operand.vmem [shape: f32[1,128], index: 7, kind: input, shape index: {}]   ;;  %s3239_s8 = inlined_call_operand.vmem [shape: f32[1,128], index: 8, kind: input, shape index: {}]   ;;  %s3240_s9 = inlined_call_operand.hbm [shape: bf16[128,256], index: 9, kind: input, shape index: {}]   ;;  %s3241_s10 = inlined_call_operand.vmem [shape: f32[1,256], index: 10, kind: input, shape index: {}]   ;;  %s3242_s11 = inlined_call_operand.hbm [shape: bf16[256,128], index: 11, kind: input, shape index: {}]   ;;  %s3243_s12 = inlined_call_operand.vmem [shape: f32[1,128], index: 12, kind: input, shape index: {}]   ;;  %s3244_s13 = inlined_call_operand.hbm [shape: f32[32,128], index: 13, kind: output, shape index: {}]  }
   0x1   :  { %19 = vsyncpa [#allocation7], 0 }
   0x2   :  { %20 = vsyncpa [#allocation10], 0 }
   0x3   :  { %21 = vsyncpa [#allocation5], 0  ;;  %s2730_s25 = smov [#allocation6]   ;;  %s2590_s29 = scalar_lea.hbm %s3234_s3, 3072 }
   0x4   :  { %s43_s26 = sshll.u32 %s2730_s25, 4  ;;  %p2591_p0 = scmp.ne.s32.totalorder %s3234_s3, %s2590_s29  ;;  %s44_s26 = int_to_ptr.vmem [resolvable:$true] %s43_s26 }
   0x5   :  { %p2594_p1 = scmp.lt.u32.totalorder %s2590_s29, %s3234_s3 }
   0x7   :  { %p2596_p2 = pnand %p2594_p1, %p2591_p0 }
   0x9   :  { %2599 = shalt.err (!%p2596_p2)
}
   0xa   :  { %s2600_s17 = scalar_lea.vmem %s44_s26, 3072  ;;  %p2605_p4 = scmp.lt.s32.totalorder %s44_s26, %s44_s26 }
   0xb   :  { %p2601_p3 = scmp.ne.s32.totalorder %s44_s26, %s2600_s17  ;;  %p2606_p5 = scmp.lt.s32.totalorder %s2600_s17, %s2600_s17 }
   0xd   :  { %p2607_p6 = por %p2606_p5, %p2605_p4 }
   0xf   :  { %p2608_p7 = pnand %p2607_p6, %p2601_p3 }
  0x11   :  { %2611 = shalt.err (!%p2608_p7)
}
  0x12   :  { %s2731_s18 = smov 192   ;;  %s2732_s19 = smov 12  }
  0x13   :  { %49 = dma.hbm_to_vmem [thread:$0]  %s3234_s3, 3072, %s44_s26, [#allocation7], %s2731_s18, %s2731_s18, %s2732_s19  }
  0x14   :  { %s2733_s22 = smov [#allocation9]   ;;  %s2734_s24 = smov [#allocation3]  }
  0x15   :  { %s75_s23 = sshll.u32 %s2733_s22, 4  ;;  %s27_s25 = sshll.u32 %s2734_s24, 4  ;;  %s76_s23 = int_to_ptr.vmem [resolvable:$true] %s75_s23  ;;  %s28_s25 = int_to_ptr.vmem [resolvable:$true] %s27_s25 }
  0x16   :  { %s2612_s29 = scalar_lea.hbm %s3240_s9, 2048 }
  0x17   :  { %p2613_p8 = scmp.ne.s32.totalorder %s3240_s9, %s2612_s29  ;;  %p2616_p9 = scmp.lt.u32.totalorder %s2612_s29, %s3240_s9 }
  0x19   :  { %p2618_p10 = pnand %p2616_p9, %p2613_p8 }
  0x1b   :  { %2621 = shalt.err (!%p2618_p10)
}
  0x1c   :  { %s2622_s3 = scalar_lea.vmem %s76_s23, 2048  ;;  %p2627_p12 = scmp.lt.s32.totalorder %s76_s23, %s76_s23 }
  0x1d   :  { %p2623_p11 = scmp.ne.s32.totalorder %s76_s23, %s2622_s3  ;;  %p2628_p13 = scmp.lt.s32.totalorder %s2622_s3, %s2622_s3 }
  0x1f   :  { %p2629_p0 = por %p2628_p13, %p2627_p12 }
  0x21   :  { %p2630_p1 = pnand %p2629_p0, %p2623_p11 }
  0x23   :  { %2633 = shalt.err (!%p2630_p1)
}
  0x24   :  { %s2735_s26 = smov 128   ;;  %s2736_s17 = smov 8  }
  0x25   :  { %81 = dma.hbm_to_vmem [thread:$0]  %s3240_s9, 2048, %s76_s23, [#allocation10], %s2735_s26, %s2735_s26, %s2736_s17  }
  0x26   :  { %s2634_s22 = scalar_lea.hbm %s3231_s0, 512 }
  0x27   :  { %p2635_p2 = scmp.ne.s32.totalorder %s3231_s0, %s2634_s22  ;;  %p2638_p3 = scmp.lt.u32.totalorder %s2634_s22, %s3231_s0 }
  0x29   :  { %p2640_p4 = pnand %p2638_p3, %p2635_p2 }
  0x2b   :  { %2643 = shalt.err (!%p2640_p4)
}
  0x2c   :  { %s2644_s30 = scalar_lea.vmem %s28_s25, 512  ;;  %p2649_p6 = scmp.lt.s32.totalorder %s28_s25, %s28_s25 }
  0x2d   :  { %p2645_p5 = scmp.ne.s32.totalorder %s28_s25, %s2644_s30  ;;  %p2650_p7 = scmp.lt.s32.totalorder %s2644_s30, %s2644_s30 }
  0x2f   :  { %p2651_p8 = por %p2650_p7, %p2649_p6 }
  0x31   :  { %p2652_p9 = pnand %p2651_p8, %p2645_p5 }
  0x33   :  { %2655 = shalt.err (!%p2652_p9)
}
  0x34   :  { %33 = dma.hbm_to_vmem [thread:$0]  %s3231_s0, 512, %s28_s25, [#allocation4], %s2735_s26, %s2735_s26, %s2736_s17  }
  0x35   :  { %s2737_s14 = smov [#allocation8]   ;;  %s2656_s18 = scalar_lea.hbm %s3236_s5, 1024 }
  0x36   :  { %s57_s15 = sshll.u32 %s2737_s14, 4  ;;  %p2657_p10 = scmp.ne.s32.totalorder %s3236_s5, %s2656_s18  ;;  %s58_s15 = int_to_ptr.vmem [resolvable:$true] %s57_s15 }
  0x37   :  { %p2660_p11 = scmp.lt.u32.totalorder %s2656_s18, %s3236_s5 }
  0x39   :  { %p2662_p12 = pnand %p2660_p11, %p2657_p10 }
  0x3b   :  { %2665 = shalt.err (!%p2662_p12)
}
  0x3c   :  { %s2666_s24 = scalar_lea.vmem %s58_s15, 1024  ;;  %p2671_p0 = scmp.lt.s32.totalorder %s58_s15, %s58_s15 }
  0x3d   :  { %p2667_p13 = scmp.ne.s32.totalorder %s58_s15, %s2666_s24  ;;  %p2672_p1 = scmp.lt.s32.totalorder %s2666_s24, %s2666_s24 }
  0x3f   :  { %p2673_p2 = por %p2672_p1, %p2671_p0 }
  0x41   :  { %p2674_p3 = pnand %p2673_p2, %p2667_p13 }
  0x43   :  { %2677 = shalt.err (!%p2674_p3)
}
  0x44   :  { %s2738_s0 = smov 64   ;;  %s2739_s25 = smov 4  }
  0x45   :  { %63 = dma.hbm_to_vmem [thread:$0]  %s3236_s5, 1024, %s58_s15, [#allocation7], %s2738_s0, %s2738_s0, %s2739_s25  }
  0x46   :  { %s2740_s29 = smov [#allocation11]   ;;  %s2678_s14 = scalar_lea.hbm %s3242_s11, 2048 }
  0x47   :  { %s89_s30 = sshll.u32 %s2740_s29, 4  ;;  %p2679_p4 = scmp.ne.s32.totalorder %s3242_s11, %s2678_s14  ;;  %s90_s30 = int_to_ptr.vmem [resolvable:$true] %s89_s30 }
  0x48   :  { %p2682_p5 = scmp.lt.u32.totalorder %s2678_s14, %s3242_s11 }
  0x4a   :  { %p2684_p6 = pnand %p2682_p5, %p2679_p4 }
  0x4c   :  { %2687 = shalt.err (!%p2684_p6)
}
  0x4d   :  { %s2688_s20 = scalar_lea.vmem %s90_s30, 2048  ;;  %p2693_p8 = scmp.lt.s32.totalorder %s90_s30, %s90_s30 }
  0x4e   :  { %p2689_p7 = scmp.ne.s32.totalorder %s90_s30, %s2688_s20  ;;  %p2694_p9 = scmp.lt.s32.totalorder %s2688_s20, %s2688_s20 }
  0x50   :  { %p2695_p10 = por %p2694_p9, %p2693_p8 }
  0x52   :  { %p2696_p11 = pnand %p2695_p10, %p2689_p7 }
  0x54   :  { %2699 = shalt.err (!%p2696_p11)
}
  0x55   :  { %95 = dma.hbm_to_vmem [thread:$0]  %s3242_s11, 2048, %s90_s30, [#allocation10], %s2738_s0, %s2738_s0, %s2739_s25  }
  0x56   :  { %2722 = dma.done.wait [#allocation4], 512  }
  0x57   :  { %2723 = vsyncadd [#allocation4], 4294966784 }
  0x58   :  { %2724 = dma.done.wait [#allocation7], 4096  }
  0x59   :  { %2725 = vsyncadd [#allocation7], 4294963200 }
  0x5a   :  { %2726 = dma.done.wait [#allocation10], 4096  }
  0x5b   :  { %2727 = vsyncadd [#allocation10], 4294963200  ;;  %v114_v0 = vld [vmem:[#allocation3] sm:$0xff]  ;;  %v116_v1 = vld [vmem:[#allocation3 + $0x10] sm:$0xff]  ;;  %v2741_v39 = vmov 0   ;;  %vm2743_vm0 = vmmov 0  }
  0x5c   :  { %v115_v2 = vld [vmem:[#allocation3 + $0x8] sm:$0xff]  ;;  %120 = vadd.xlane.f32.xlu0 %v114_v0  ;;  %124 = vadd.xlane.f32.xlu1 %v116_v1  ;;  %v117_v3 = vld [vmem:[#allocation3 + $0x18] sm:$0xff]  ;;  %v2410_v4 = vld [vmem:[#allocation6 + $0x4] ss:$12 sps:$4 sm:$0xff]   ;;  %vm472_vm1 = vcmask 261120   ;;  %s2745_s25 = smov 32  }
  0x5d   :  { %v2412_v5 = vld [vmem:[#allocation6] ss:$12 sps:$4 sm:$0xff]   ;;  %v2413_v6 = vld [vmem:[#allocation6 + $0x1c] ss:$12 sps:$4 sm:$0xff]   ;;  %364 = vmatprep.subr.bf16.mxu0 %v2410_v4  ;;  %v2416_v24 = vld [vmem:[#allocation6 + $0x18] ss:$12 sps:$4 sm:$0xff]   ;;  %396 = vmatprep.mubr.bf16.mxu0 %v2741_v39 }
  0x5e   :  { %v2415_v7 = vld [vmem:[#allocation6 + $0x8] ss:$12 sps:$4 sm:$0xff]   ;;  %365 = vmatpush1.bf16.msra.mxu0 %v2412_v5  ;;  %v2419_v26 = vld [vmem:[#allocation6 + $0x20] ss:$12 sps:$4 sm:$0xff]   ;;  %v2420_v27 = vld [vmem:[#allocation6 + $0x30] ss:$12 sps:$4 sm:$0xff]  }
  0x5f   :  { %2257 = vmatprep.subr.bf16.mxu1 %v2415_v7  ;;  %366 = vmatprep.subr.bf16.mxu0 %v2413_v6  ;;  %v2417_v25 = vld [vmem:[#allocation6 + $0x34] ss:$12 sps:$4 sm:$0xff]   ;;  %v2421_v28 = vld [vmem:[#allocation6 + $0x4c] ss:$12 sps:$4 sm:$0xff]   ;;  %v2425_v31 = vld [vmem:[#allocation6 + $0x64] ss:$12 sps:$4 sm:$0xff]  }
  0x60   :  { %122 = vadd.xlane.f32.xlu0 %v115_v2  ;;  %126 = vadd.xlane.f32.xlu1 %v117_v3  ;;  %v2423_v29 = vld [vmem:[#allocation6 + $0x38] ss:$12 sps:$4 sm:$0xff]   ;;  %v2424_v30 = vld [vmem:[#allocation6 + $0x48] ss:$12 sps:$4 sm:$0xff]   ;;  %v2427_v32 = vld [vmem:[#allocation6 + $0x50] ss:$12 sps:$4 sm:$0xff]  }
  0x61   :  { %2258 = vmatpush3.bf16.msra.mxu1 %v2415_v7  ;;  %v2428_v33 = vld [vmem:[#allocation6 + $0x60] ss:$12 sps:$4 sm:$0xff]   ;;  %v2429_v34 = vld [vmem:[#allocation6 + $0x7c] ss:$12 sps:$4 sm:$0xff]   ;;  %v2432_v36 = vld [vmem:[#allocation6 + $0x78] ss:$12 sps:$4 sm:$0xff]  }
  0x62   :  { %367 = vmatpush1.bf16.msra.mxu0 %v2416_v24  ;;  %2259 = vmatprep.subr.bf16.mxu1 %v2419_v26  ;;  %v2431_v35 = vld [vmem:[#allocation6 + $0x68] ss:$12 sps:$4 sm:$0xff]   ;;  %v2435_v38 = vld [vmem:[#allocation6 + $0x80] ss:$12 sps:$4 sm:$0xff]   ;;  %v2436_v40 = vld [vmem:[#allocation6 + $0x90] ss:$12 sps:$4 sm:$0xff]  }
  0x63   :  { %368 = vmatprep.subr.bf16.mxu0 %v2417_v25  ;;  %v2433_v37 = vld [vmem:[#allocation6 + $0x94] ss:$12 sps:$4 sm:$0xff]   ;;  %v2437_v41 = vld [vmem:[#allocation6 + $0xac] ss:$12 sps:$4 sm:$0xff]   ;;  %v2441_v44 = vld [vmem:[#allocation6 + $0xb0] ss:$12 sps:$4 sm:$0xff]  }
  0x64   :  { %v2439_v42 = vld [vmem:[#allocation6 + $0x98] ss:$12 sps:$4 sm:$0xff]   ;;  %v2440_v43 = vld [vmem:[#allocation6 + $0xa8] ss:$12 sps:$4 sm:$0xff]   ;;  %v2091_v59 = vld [vmem:[%s3232_s1] ss:$0 sm:$0xff] }
  0x65   :  { %2260 = vmatpush3.bf16.msra.mxu1 %v2419_v26  ;;  %vm520_vm2 = vcmask 130048   ;;  %vm719_vm3 = vcmask 523520   ;;  %vm847_vm4 = vcmask 785920   ;;  %vm975_vm5 = vcmask 1048320  }
  0x66   :  { %369 = vmatpush1.bf16.msra.mxu0 %v2420_v27  ;;  %2261 = vmatprep.subr.bf16.mxu1 %v2423_v29 }
  0x67   :  { %370 = vmatprep.subr.bf16.mxu0 %v2421_v28 }
  0x69   :  { %2262 = vmatpush3.bf16.msra.mxu1 %v2423_v29 }
  0x6a   :  { %371 = vmatpush1.bf16.msra.mxu0 %v2424_v30  ;;  %2263 = vmatprep.subr.bf16.mxu1 %v2427_v32 }
  0x6b   :  { %372 = vmatprep.subr.bf16.mxu0 %v2425_v31 }
  0x6d   :  { %2264 = vmatpush3.bf16.msra.mxu1 %v2427_v32 }
  0x6e   :  { %373 = vmatpush1.bf16.msra.mxu0 %v2428_v33  ;;  %2265 = vmatprep.subr.bf16.mxu1 %v2431_v35 }
  0x6f   :  { %374 = vmatprep.subr.bf16.mxu0 %v2429_v34 }
  0x71   :  { %2266 = vmatpush3.bf16.msra.mxu1 %v2431_v35 }
  0x72   :  { %375 = vmatpush1.bf16.msra.mxu0 %v2432_v36  ;;  %2267 = vmatprep.subr.bf16.mxu1 %v2435_v38 }
  0x73   :  { %376 = vmatprep.subr.bf16.mxu0 %v2433_v37 }
  0x75   :  { %2268 = vmatpush3.bf16.msra.mxu1 %v2435_v38 }
  0x76   :  { %377 = vmatpush1.bf16.msra.mxu0 %v2436_v40  ;;  %2269 = vmatprep.subr.bf16.mxu1 %v2439_v42 }
  0x77   :  { %378 = vmatprep.subr.bf16.mxu0 %v2437_v41 }
  0x79   :  { %2270 = vmatpush3.bf16.msra.mxu1 %v2439_v42 }
  0x7a   :  { %379 = vmatpush1.bf16.msra.mxu0 %v2440_v43  ;;  %2271 = vmatprep.subr.bf16.mxu1 %v2441_v44 }
  0x7d   :  { %2272 = vmatpush3.bf16.msra.mxu1 %v2441_v44 }
  0xe9   :  { %v121_v8 = vpop.xlane.xlu0 %120  ;;  %v125_v9 = vpop.xlane.xlu1 %124 }
  0xea   :  { %v129_v10 = vmul.f32 0.0078125, %v121_v8  ;;  %v131_v11 = vmul.f32 0.0078125, %v125_v9 }
  0xec   :  { %v2887_v12 = vsub.f32 %v114_v0, %v129_v10  ;;  %v2889_v13 = vsub.f32 %v116_v1, %v131_v11  ;;  %v2092_v0 = vld [vmem:[%s3233_s2] ss:$0 sm:$0xff] }
  0xed   :  { %v123_v14 = vpop.xlane.xlu0 %122  ;;  %v127_v15 = vpop.xlane.xlu1 %126 }
  0xee   :  { %v130_v16 = vmul.f32 0.0078125, %v123_v14  ;;  %v137_v17 = vmul.f32 %v2887_v12, %v2887_v12  ;;  %v132_v18 = vmul.f32 0.0078125, %v127_v15  ;;  %v139_v21 = vmul.f32 %v2889_v13, %v2889_v13 }
  0xef   :  { %v2742_v14 = vmov 0.0  }
  0xf0   :  { %v2893_v19 = vsub.f32 %v115_v2, %v130_v16  ;;  %141 = vadd.xlane.f32.xlu0 %v137_v17  ;;  %v2895_v20 = vsub.f32 %v117_v3, %v132_v18  ;;  %2277 = vmatprep.subr.bf16.mxu0 %v2742_v14  ;;  %v219_v17 = vld [vmem:[%s3235_s4] sm:$0x7]  ;;  %s2744_s4 = smov 96  }
  0xf1   :  { %2289 = vmatprep.subr.bf16.mxu1 %v2742_v14 }
  0xf2   :  { %v138_v22 = vmul.f32 %v2893_v19, %v2893_v19  ;;  %v140_v23 = vmul.f32 %v2895_v20, %v2895_v20 }
  0xf4   :  { %145 = vadd.xlane.f32.xlu0 %v139_v21  ;;  %143 = vadd.xlane.f32.xlu1 %v138_v22 }
  0xf8   :  { %147 = vadd.xlane.f32.xlu1 %v140_v23 }
 0x17d   :  { %v142_v45 = vpop.xlane.xlu0 %141 }
 0x17e   :  { %v149_v46 = vmul.f32 0.0078125, %v142_v45 }
 0x180   :  { %v153_v47 = vadd.f32 1e-06, %v149_v46 }
 0x181   :  { %v144_v48 = vpop.xlane.xlu1 %143  ;;  %v146_v49 = vpop.xlane.xlu0 %145 }
 0x182   :  { %2490 = vrsqrt.f32 %v153_v47  ;;  %v150_v50 = vmul.f32 0.0078125, %v144_v48  ;;  %v151_v51 = vmul.f32 0.0078125, %v146_v49 }
 0x184   :  { %v154_v52 = vadd.f32 1e-06, %v150_v50  ;;  %v155_v53 = vadd.f32 1e-06, %v151_v51 }
 0x185   :  { %v148_v54 = vpop.xlane.xlu1 %147 }
 0x186   :  { %2492 = vrsqrt.f32 %v154_v52  ;;  %v152_v55 = vmul.f32 0.0078125, %v148_v54 }
 0x187   :  { %2494 = vrsqrt.f32 %v155_v53 }
 0x188   :  { %v156_v56 = vadd.f32 1e-06, %v152_v55 }
 0x18a   :  { %2496 = vrsqrt.f32 %v156_v56 }
 0x18c   :  { %v2491_v57 = vpop.eup %2490 }
 0x18d   :  { %v161_v58 = vmul.f32 %v2491_v57, %v2887_v12 }
 0x18f   :  { %v171_v63 = vmul.f32 %v2091_v59, %v161_v58 }
 0x190   :  { %v2493_v60 = vpop.eup %2492 }
 0x191   :  { %v2495_v61 = vpop.eup %2494  ;;  %v162_v62 = vmul.f32 %v2493_v60, %v2893_v19  ;;  %v181_v4 = vadd.f32 %v2092_v0, %v171_v63 }
 0x192   :  { %v163_v1 = vmul.f32 %v2495_v61, %v2889_v13  ;;  %v221_v13 = vlaneseq }
 0x193   :  { %v172_v2 = vmul.f32 %v2091_v59, %v162_v62 }
 0x194   :  { %v2497_v3 = vpop.eup %2496  ;;  %v173_v7 = vmul.f32 %v2091_v59, %v163_v1  ;;  %v2921_v15 = vshrl.u32 %v221_v13, 7 }
 0x195   :  { %v182_v5 = vadd.f32 %v2092_v0, %v172_v2  ;;  %v164_v6 = vmul.f32 %v2497_v3, %v2895_v20 }
 0x196   :  { %v183_v10 = vadd.f32 %v2092_v0, %v173_v7  ;;  %v223_v16 = vsub.s32 0, %v2921_v15  ;;  %v227_v18 = vsub.s32 1, %v2921_v15  ;;  %v231_v19 = vsub.s32 2, %v2921_v15 }
 0x197   :  { %v185_v8 = vpack.c.bf16 %v182_v5, %v181_v4  ;;  %v174_v9 = vmul.f32 %v2091_v59, %v164_v6 }
 0x198   :  { %v224_v20 = vrot.slane %v219_v17, %v223_v16  ;;  %v228_v22 = vrot.slane %v219_v17, %v227_v18  ;;  %v232_v24 = vrot.slane %v219_v17, %v231_v19 }
 0x199   :  { %397 = vmatmul.mubr.bf16.vlgmr.msra.gmra.mrb[0].mxu0 %v185_v8  ;;  %2273 = vmatprep.mubr.bf16.mxu1 %v185_v8  ;;  %v184_v11 = vadd.f32 %v2092_v0, %v174_v9 }
 0x19a   :  { %406 = vmatprep.mubr.bf16.mxu0 %v2741_v39 }
 0x19b   :  { %v186_v12 = vpack.c.bf16 %v184_v11, %v183_v10 }
 0x19d   :  { %2274 = vmatmul.mubr.bf16.vlgmr.msra.gmra.mrb[0].mxu1 %v186_v12 }
 0x19e   :  { %2291 = vmatprep.mubr.msk.bf16.mxu1 %vm2743_vm0, %v2742_v14 }
 0x1a1   :  { %407 = vmatmul.mubr.bf16.gmra.mrb[4].mxu0 %v186_v12 }
 0x1a2   :  { %2279 = vmatprep.mubr.msk.bf16.mxu0 %vm2743_vm0, %v2742_v14 }
 0x26c   :  { %v398_v21 = vpop.f32.mrb[0].mxu0 }
 0x26d   :  { %v400_v23 = vpop.f32.mrb[1].mxu0  ;;  %v399_v26 = vadd.f32 %v398_v21, %v224_v20 }
 0x26e   :  { %v402_v25 = vpop.f32.mrb[2].mxu0  ;;  %v401_v29 = vadd.f32 %v400_v23, %v228_v22 }
 0x26f   :  { %v403_v27 = vadd.f32 %v402_v25, %v224_v20  ;;  %v404_v28 = vpop.f32.mrb[3].mxu0 }
 0x270   :  { %v405_v30 = vadd.f32 %v404_v28, %v228_v22  ;;  %v2275_v31 = vpop.f32.mrb[0].mxu1 }
 0x271   :  { %v466_v32 = vpack.c.bf16 %v403_v27, %v399_v26  ;;  %v460_v33 = vadd.f32 %v2275_v31, %v232_v24  ;;  %v451_v34 = vpop.f32.mrb[1].mxu1 }
 0x272   :  { %v467_v35 = vpack.c.bf16 %v405_v30, %v401_v29  ;;  %v2276_v36 = vpop.f32.mrb[2].mxu1  ;;  %v452_v40 = vadd.f32 %v451_v34, %v232_v24 }
 0x273   :  { %v463_v37 = vadd.f32 %v2276_v36, %v232_v24  ;;  %591 = vrot.lane.b32.xlu1 %v466_v32, %s2744_s4  ;;  %v454_v38 = vpop.f32.mrb[3].mxu1 }
 0x274   :  { %v455_v41 = vadd.f32 %v454_v38, %v232_v24  ;;  %594 = vrot.lane.b32.xlu0 %v467_v35, %s2744_s4  ;;  %v408_v42 = vpop.f32.mrb[4].mxu0  ;;  %v477_v43 = vsel %vm472_vm1, %v467_v35, 0 }
 0x275   :  { %v2936_v44 = vpack.c.bf16 %v463_v37, %v460_v33  ;;  %v410_v45 = vpop.f32.mrb[5].mxu0  ;;  %2278 = vmatpush3.bf16.xpose.msra.mxu0 %v477_v43  ;;  %v409_v48 = vadd.f32 %v408_v42, %v224_v20 }
 0x276   :  { %v2938_v46 = vpack.c.bf16 %v455_v41, %v452_v40  ;;  %v412_v47 = vpop.f32.mrb[6].mxu0  ;;  %2283 = vmatprep.subr.bf16.mxu0 %v2742_v14  ;;  %v411_v51 = vadd.f32 %v410_v45, %v228_v22 }
 0x277   :  { %v413_v49 = vadd.f32 %v412_v47, %v224_v20  ;;  %723 = vrot.lane.b32.xlu1 %v467_v35, %s2738_s0  ;;  %v414_v50 = vpop.f32.mrb[7].mxu0 }
 0x278   :  { %v415_v52 = vadd.f32 %v414_v50, %v228_v22  ;;  %851 = vrot.lane.b32.xlu0 %v467_v35, %s2745_s25 }
 0x279   :  { %v469_v53 = vpack.c.bf16 %v413_v49, %v409_v48 }
 0x27a   :  { %v470_v54 = vpack.c.bf16 %v415_v52, %v411_v51 }
 0x27b   :  { %721 = vrot.lane.b32.xlu1 %v466_v32, %s2738_s0 }
 0x27c   :  { %2280 = vmatmul.mubr.msk.bf16.vlgmr.msra.gmra.mrb[8].mxu0 %vm472_vm1, %v466_v32  ;;  %1097 = vrot.lane.b32.xlu0 %v470_v54, %s2744_s4  ;;  %v981_v0 = vsel %vm472_vm1, %v470_v54, 0 }
 0x27d   :  { %2284 = vmatpush3.bf16.msra.mxu0 %v2938_v46  ;;  %2285 = vmatprep.mubr.msk.bf16.mxu0 %vm2743_vm0, %v2742_v14 }
 0x27e   :  { %2295 = vmatprep.subr.bf16.mxu0 %v2742_v14 }
 0x27f   :  { %849 = vrot.lane.b32.xlu1 %v466_v32, %s2745_s25 }
 0x280   :  { %1225 = vrot.lane.b32.xlu0 %v470_v54, %s2738_s0 }
 0x283   :  { %1094 = vrot.lane.b32.xlu1 %v469_v53, %s2744_s4 }
 0x284   :  { %1352 = vrot.lane.b32.xlu0 %v470_v54, %s2745_s25 }
 0x287   :  { %1223 = vrot.lane.b32.xlu1 %v469_v53, %s2738_s0 }
 0x288   :  { %663 = vrot.lane.b32.xlu0 %v2938_v46, %s2744_s4 }
 0x28b   :  { %1350 = vrot.lane.b32.xlu1 %v469_v53, %s2745_s25 }
 0x28f   :  { %791 = vrot.lane.b32.xlu1 %v2938_v46, %s2738_s0 }
 0x2e5   :  { %v592_v55 = vpop.permute.xlu1 %591 }
 0x2e6   :  { %v595_v56 = vpop.permute.xlu0 %594 }
 0x2e7   :  { %v600_v57 = vsel %vm472_vm1, %v595_v56, 0 }
 0x2e8   :  { %2290 = vmatpush3.bf16.xpose.msra.mxu1 %v600_v57 }
 0x2e9   :  { %2301 = vmatprep.subr.bf16.mxu1 %v2742_v14  ;;  %v724_v58 = vpop.permute.xlu1 %723 }
 0x2ea   :  { %v729_v59 = vsel %vm472_vm1, %v724_v58, 0  ;;  %v852_v60 = vpop.permute.xlu0 %851 }
 0x2eb   :  { %v857_v62 = vsel %vm472_vm1, %v852_v60, 0 }
 0x2ed   :  { %v722_v61 = vpop.permute.xlu1 %721 }
 0x2ee   :  { %v1098_v1 = vpop.permute.xlu0 %1097 }
 0x2ef   :  { %2292 = vmatmul.mubr.msk.bf16.vlgmr.msra.gmra.mrb[4].mxu1 %vm472_vm1, %v592_v55  ;;  %v1103_v2 = vsel %vm472_vm1, %v1098_v1, 0 }
 0x2f0   :  { %2302 = vmatpush3.bf16.xpose.msra.mxu1 %v729_v59  ;;  %2303 = vmatprep.mubr.msk.bf16.mxu1 %vm2743_vm0, %v2742_v14 }
 0x2f1   :  { %2313 = vmatprep.subr.bf16.mxu1 %v2742_v14  ;;  %v850_v63 = vpop.permute.xlu1 %849 }
 0x2f2   :  { %v1226_v3 = vpop.permute.xlu0 %1225 }
 0x2f3   :  { %v1231_v5 = vsel %vm472_vm1, %v1226_v3, 0 }
 0x2f5   :  { %v1095_v4 = vpop.permute.xlu1 %1094 }
 0x2f6   :  { %v1353_v6 = vpop.permute.xlu0 %1352 }
 0x2f7   :  { %2304 = vmatmul.mubr.msk.bf16.vlgmr.msra.gmra.mrb[8].mxu1 %vm472_vm1, %v722_v61  ;;  %v1358_v8 = vsel %vm472_vm1, %v1353_v6, 0 }
 0x2f8   :  { %2314 = vmatpush3.bf16.xpose.msra.mxu1 %v857_v62  ;;  %2315 = vmatprep.mubr.msk.bf16.mxu1 %vm2743_vm0, %v2742_v14 }
 0x2f9   :  { %2325 = vmatprep.subr.bf16.mxu1 %v2742_v14  ;;  %v1224_v7 = vpop.permute.xlu1 %1223 }
 0x2fa   :  { %v664_v38 = vpop.permute.xlu0 %663 }
 0x2fd   :  { %v1351_v9 = vpop.permute.xlu1 %1350 }
 0x2ff   :  { %2316 = vmatmul.mubr.msk.bf16.vlgmr.msra.gmra.mrb[12].mxu1 %vm472_vm1, %v850_v63 }
 0x300   :  { %2326 = vmatpush3.bf16.xpose.msra.mxu1 %v981_v0  ;;  %2327 = vmatprep.mubr.msk.bf16.mxu1 %vm2743_vm0, %v2742_v14 }
 0x301   :  { %2337 = vmatprep.subr.bf16.mxu1 %v2742_v14  ;;  %v3022_v43 = vpop.permute.xlu1 %791 }
 0x307   :  { %2328 = vmatmul.mubr.msk.bf16.vlgmr.msra.gmra.mrb[16].mxu1 %vm472_vm1, %v469_v53 }
 0x308   :  { %2338 = vmatpush3.bf16.xpose.msra.mxu1 %v1103_v2  ;;  %2339 = vmatprep.mubr.msk.bf16.mxu1 %vm2743_vm0, %v2742_v14 }
 0x309   :  { %2349 = vmatprep.subr.bf16.mxu1 %v2742_v14 }
 0x30f   :  { %2340 = vmatmul.mubr.msk.bf16.vlgmr.msra.gmra.mrb[20].mxu1 %vm472_vm1, %v1095_v4 }
 0x310   :  { %2350 = vmatpush3.bf16.xpose.msra.mxu1 %v1231_v5  ;;  %2351 = vmatprep.mubr.msk.bf16.mxu1 %vm2743_vm0, %v2742_v14 }
 0x311   :  { %2361 = vmatprep.subr.bf16.mxu1 %v2742_v14 }
 0x317   :  { %2352 = vmatmul.mubr.msk.bf16.vlgmr.msra.gmra.mrb[24].mxu1 %vm472_vm1, %v1224_v7 }
 0x318   :  { %2362 = vmatpush3.bf16.xpose.msra.mxu1 %v1358_v8  ;;  %2363 = vmatprep.mubr.msk.bf16.mxu1 %vm2743_vm0, %v2742_v14 }
 0x31f   :  { %2364 = vmatmul.mubr.msk.bf16.vlgmr.msra.gmra.mrb[28].mxu1 %vm472_vm1, %v1351_v9 }
 0x34f   :  { %v513_v10 = vpop.f32.mrb[8].mxu0 }
 0x350   :  { %v2281_v11 = vpop.f32.mrb[9].mxu0  ;;  %v521_v12 = vsel %vm520_vm2, %v513_v10, -inf }
 0x351   :  { %v516_v13 = vpop.f32.mrb[10].mxu0  ;;  %522 = vmax.xlane.f32.xlu0 %v521_v12 }
 0x352   :  { %v2282_v17 = vpop.f32.mrb[11].mxu0  ;;  %v524_v19 = vsel %vm520_vm2, %v516_v13, -inf }
 0x353   :  { %525 = vmax.xlane.f32.xlu1 %v524_v19 }
 0x3c2   :  { %v2994_v20 = vpop.f32.mrb[4].mxu1 }
 0x3c3   :  { %v2293_v21 = vpop.f32.mrb[5].mxu1  ;;  %v643_v22 = vsel %vm520_vm2, %v2994_v20, -inf }
 0x3c4   :  { %644 = vmax.xlane.f32.xlu0 %v643_v22  ;;  %v2998_v23 = vpop.f32.mrb[6].mxu1 }
 0x3c5   :  { %v2294_v24 = vpop.f32.mrb[7].mxu1  ;;  %v646_v25 = vsel %vm520_vm2, %v2998_v23, -inf }
 0x3c8   :  { %647 = vmax.xlane.f32.xlu0 %v646_v25 }
 0x3ca   :  { %v3002_v26 = vpop.f32.mrb[8].mxu1 }
 0x3cb   :  { %v2305_v27 = vpop.f32.mrb[9].mxu1  ;;  %v772_v28 = vsel %vm520_vm2, %v3002_v26, -inf }
 0x3cc   :  { %773 = vmax.xlane.f32.xlu0 %v772_v28  ;;  %v3006_v29 = vpop.f32.mrb[10].mxu1 }
 0x3cd   :  { %v2306_v30 = vpop.f32.mrb[11].mxu1  ;;  %v775_v31 = vsel %vm520_vm2, %v3006_v29, -inf }
 0x3ce   :  { %776 = vmax.xlane.f32.xlu1 %v775_v31 }
 0x3d2   :  { %v3010_v32 = vpop.f32.mrb[12].mxu1 }
 0x3d3   :  { %v2317_v33 = vpop.f32.mrb[13].mxu1  ;;  %v900_v34 = vsel %vm520_vm2, %v3010_v32, -inf }
 0x3d4   :  { %901 = vmax.xlane.f32.xlu0 %v900_v34  ;;  %v3014_v35 = vpop.f32.mrb[14].mxu1 }
 0x3d5   :  { %v2318_v36 = vpop.f32.mrb[15].mxu1  ;;  %v903_v37 = vsel %vm520_vm2, %v3014_v35, -inf }
 0x3d6   :  { %904 = vmax.xlane.f32.xlu1 %v903_v37 }
 0x3da   :  { %v3018_v40 = vpop.f32.mrb[16].mxu1 }
 0x3db   :  { %v2329_v41 = vpop.f32.mrb[17].mxu1  ;;  %v1024_v42 = vsel %vm520_vm2, %v3018_v40, -inf }
 0x3dc   :  { %1025 = vmax.xlane.f32.xlu0 %v1024_v42  ;;  %v3024_v45 = vpop.f32.mrb[18].mxu1 }
 0x3dd   :  { %v2330_v47 = vpop.f32.mrb[19].mxu1  ;;  %v1027_v48 = vsel %vm520_vm2, %v3024_v45, -inf }
 0x3de   :  { %1028 = vmax.xlane.f32.xlu1 %v1027_v48  ;;  %v523_v49 = vpop.xlane.xlu0 %522 }
 0x3df   :  { %v527_v50 = vsub.f32 %v513_v10, %v523_v49 }
 0x3e0   :  { %v526_v51 = vpop.xlane.xlu1 %525 }
 0x3e1   :  { %v529_v52 = vmul.f32 1.442695, %v527_v50  ;;  %v528_v53 = vsub.f32 %v516_v13, %v526_v51 }
 0x3e2   :  { %v3028_v54 = vpop.f32.mrb[20].mxu1 }
 0x3e3   :  { %v531_v55 = vmul.f32 1.442695, %v528_v53  ;;  %v2341_v56 = vpop.f32.mrb[21].mxu1  ;;  %v1146_v57 = vsel %vm520_vm2, %v3028_v54, -inf  ;;  %2498 = vpow2.f32 %v529_v52 }
 0x3e4   :  { %1147 = vmax.xlane.f32.xlu1 %v1146_v57  ;;  %v3032_v58 = vpop.f32.mrb[22].mxu1 }
 0x3e5   :  { %2500 = vpow2.f32 %v531_v55  ;;  %v2342_v59 = vpop.f32.mrb[23].mxu1  ;;  %v1149_v60 = vsel %vm520_vm2, %v3032_v58, -inf }
 0x3e8   :  { %1150 = vmax.xlane.f32.xlu1 %v1149_v60 }
 0x3ea   :  { %v3036_v61 = vpop.f32.mrb[24].mxu1 }
 0x3eb   :  { %v2353_v62 = vpop.f32.mrb[25].mxu1  ;;  %v1274_v10 = vsel %vm520_vm2, %v3036_v61, -inf }
 0x3ec   :  { %v3038_v63 = vpop.f32.mrb[26].mxu1 }
 0x3ed   :  { %v2354_v0 = vpop.f32.mrb[27].mxu1  ;;  %v1277_v1 = vsel %vm520_vm2, %v3038_v63, -inf  ;;  %v3042_v2 = vpop.eup %2498 }
 0x3ee   :  { %1278 = vmax.xlane.f32.xlu1 %v1277_v1 }
 0x3ef   :  { %v3044_v3 = vpop.eup %2500 }
 0x3f0   :  { %v539_v4 = vpack.c.bf16 %v3044_v3, %v3042_v2 }
 0x3f2   :  { %919 = vrot.lane.b32.xlu0 %v2938_v46, %s2745_s25  ;;  %2286 = vmatmul.mubr.msk.bf16.vlgmr.msra.gmra.mrb[12].mxu0 %vm520_vm2, %v539_v4  ;;  %v3051_v5 = vpop.f32.mrb[28].mxu1 }
 0x3f3   :  { %2296 = vmatpush3.bf16.msra.mxu0 %v664_v38  ;;  %v2365_v6 = vpop.f32.mrb[29].mxu1  ;;  %v1401_v7 = vsel %vm520_vm2, %v3051_v5, -inf  ;;  %2297 = vmatprep.mubr.msk.bf16.mxu0 %vm2743_vm0, %v2742_v14 }
 0x3f4   :  { %1402 = vmax.xlane.f32.xlu1 %v1401_v7  ;;  %v3057_v8 = vpop.f32.mrb[30].mxu1  ;;  %2307 = vmatprep.subr.bf16.mxu0 %v2742_v14 }
 0x3f5   :  { %v2366_v9 = vpop.f32.mrb[31].mxu1  ;;  %v1404_v46 = vsel %vm520_vm2, %v3057_v8, -inf }
 0x3f8   :  { %1405 = vmax.xlane.f32.xlu1 %v1404_v46 }
 0x409   :  { %1166 = vrot.lane.b32.xlu1 %v2936_v44, %s2744_s4 }
 0x411   :  { %1275 = vmax.xlane.f32.xlu0 %v1274_v10 }
 0x427   :  { %1293 = vrot.lane.b32.xlu0 %v2936_v44, %s2738_s0 }
 0x42b   :  { %1420 = vrot.lane.b32.xlu0 %v2936_v44, %s2745_s25 }
 0x451   :  { %v645_v11 = vpop.xlane.xlu0 %644 }
 0x452   :  { %v649_v12 = vsub.f32 %v2994_v20, %v645_v11 }
 0x454   :  { %v651_v13 = vmul.f32 1.442695, %v649_v12 }
 0x455   :  { %v648_v17 = vpop.xlane.xlu0 %647 }
 0x456   :  { %2502 = vpow2.f32 %v651_v13  ;;  %v650_v19 = vsub.f32 %v2998_v23, %v648_v17 }
 0x458   :  { %v653_v21 = vmul.f32 1.442695, %v650_v19 }
 0x459   :  { %v774_v22 = vpop.xlane.xlu0 %773 }
 0x45a   :  { %2504 = vpow2.f32 %v653_v21  ;;  %v778_v24 = vsub.f32 %v3002_v26, %v774_v22 }
 0x45b   :  { %v777_v25 = vpop.xlane.xlu1 %776 }
 0x45c   :  { %v780_v27 = vmul.f32 1.442695, %v778_v24  ;;  %v779_v28 = vsub.f32 %v3006_v29, %v777_v25 }
 0x45e   :  { %2506 = vpow2.f32 %v780_v27  ;;  %v782_v30 = vmul.f32 1.442695, %v779_v28 }
 0x460   :  { %v2503_v31 = vpop.eup %2502  ;;  %2508 = vpow2.f32 %v782_v30 }
 0x461   :  { %v902_v33 = vpop.xlane.xlu0 %901  ;;  %v655_v20 = vsel %vm520_vm2, %v2503_v31, 0.0 }
 0x462   :  { %v906_v34 = vsub.f32 %v3010_v32, %v902_v33  ;;  %656 = vadd.xlane.f32.xlu0 %v655_v20  ;;  %v536_v20 = vsel %vm520_vm2, %v3044_v3, 0.0  ;;  %v533_v3 = vsel %vm520_vm2, %v3042_v2, 0.0 }
 0x463   :  { %v905_v23 = vpop.xlane.xlu1 %904 }
 0x464   :  { %v2505_v36 = vpop.eup %2504  ;;  %v908_v37 = vmul.f32 1.442695, %v906_v34  ;;  %v907_v38 = vsub.f32 %v3014_v35, %v905_v23 }
 0x465   :  { %v658_v26 = vsel %vm520_vm2, %v2505_v36, 0.0  ;;  %v661_v41 = vpack.c.bf16 %v2505_v36, %v2503_v31 }
 0x466   :  { %2510 = vpow2.f32 %v908_v37  ;;  %v910_v29 = vmul.f32 1.442695, %v907_v38  ;;  %659 = vadd.xlane.f32.xlu1 %v658_v26 }
 0x467   :  { %2298 = vmatmul.mubr.msk.bf16.vlgmr.msra.gmra.mrb[16].mxu0 %vm520_vm2, %v661_v41 }
 0x468   :  { %v2507_v42 = vpop.eup %2506  ;;  %2512 = vpow2.f32 %v910_v29  ;;  %2308 = vmatpush3.bf16.msra.mxu0 %v3022_v43  ;;  %2309 = vmatprep.mubr.msk.bf16.mxu0 %vm2743_vm0, %v2742_v14 }
 0x469   :  { %v1026_v32 = vpop.xlane.xlu0 %1025  ;;  %v784_v47 = vsel %vm520_vm2, %v2507_v42, 0.0  ;;  %2319 = vmatprep.subr.bf16.mxu0 %v2742_v14 }
 0x46a   :  { %v2509_v35 = vpop.eup %2508  ;;  %v1030_v48 = vsub.f32 %v3018_v40, %v1026_v32  ;;  %785 = vadd.xlane.f32.xlu0 %v784_v47 }
 0x46b   :  { %v1029_v49 = vpop.xlane.xlu1 %1028  ;;  %v790_v50 = vpack.c.bf16 %v2509_v35, %v2507_v42  ;;  %v787_v43 = vsel %vm520_vm2, %v2509_v35, 0.0 }
 0x46c   :  { %v1032_v51 = vmul.f32 1.442695, %v1030_v48  ;;  %v1031_v52 = vsub.f32 %v3024_v45, %v1029_v49 }
 0x46d   :  { %v920_v53 = vpop.permute.xlu0 %919 }
 0x46e   :  { %v1034_v55 = vmul.f32 1.442695, %v1031_v52  ;;  %788 = vadd.xlane.f32.xlu0 %v787_v43  ;;  %2514 = vpow2.f32 %v1032_v51 }
 0x46f   :  { %2310 = vmatmul.mubr.msk.bf16.vlgmr.msra.gmra.mrb[20].mxu0 %vm520_vm2, %v790_v50 }
 0x470   :  { %v2511_v56 = vpop.eup %2510  ;;  %2516 = vpow2.f32 %v1034_v55  ;;  %2320 = vmatpush3.bf16.msra.mxu0 %v920_v53  ;;  %2321 = vmatprep.mubr.msk.bf16.mxu0 %vm2743_vm0, %v2742_v14 }
 0x471   :  { %v1148_v40 = vpop.xlane.xlu1 %1147  ;;  %v912_v57 = vsel %vm520_vm2, %v2511_v56, 0.0  ;;  %2331 = vmatprep.subr.bf16.mxu0 %v2742_v14 }
 0x472   :  { %v2513_v45 = vpop.eup %2512  ;;  %v1152_v59 = vsub.f32 %v3028_v54, %v1148_v40  ;;  %913 = vadd.xlane.f32.xlu0 %v912_v57 }
 0x473   :  { %v915_v60 = vsel %vm520_vm2, %v2513_v45, 0.0  ;;  %v918_v62 = vpack.c.bf16 %v2513_v45, %v2511_v56 }
 0x474   :  { %v1154_v0 = vmul.f32 1.442695, %v1152_v59  ;;  %916 = vadd.xlane.f32.xlu1 %v915_v60 }
 0x475   :  { %v1151_v1 = vpop.xlane.xlu1 %1150 }
 0x476   :  { %2518 = vpow2.f32 %v1154_v0  ;;  %v1153_v4 = vsub.f32 %v3032_v58, %v1151_v1 }
 0x477   :  { %2322 = vmatmul.mubr.msk.bf16.vlgmr.msra.gmra.mrb[24].mxu0 %vm520_vm2, %v918_v62 }
 0x478   :  { %v1156_v6 = vmul.f32 1.442695, %v1153_v4  ;;  %2332 = vmatpush3.bf16.msra.mxu0 %v2936_v44  ;;  %2333 = vmatprep.mubr.msk.bf16.mxu0 %vm2743_vm0, %v2742_v14  ;;  %v3099_v7 = vpop.eup %2514 }
 0x479   :  { %2343 = vmatprep.subr.bf16.mxu0 %v2742_v14  ;;  %v1036_v32 = vsel %vm520_vm2, %v3099_v7, 0.0 }
 0x47a   :  { %v2517_v54 = vpop.eup %2516  ;;  %2520 = vpow2.f32 %v1156_v6 }
 0x47b   :  { %v1279_v9 = vpop.xlane.xlu1 %1278  ;;  %v1042_v46 = vpack.c.bf16 %v2517_v54, %v3099_v7  ;;  %v1039_v34 = vsel %vm520_vm2, %v2517_v54, 0.0 }
 0x47c   :  { %v1281_v10 = vsub.f32 %v3038_v63, %v1279_v9 }
 0x47e   :  { %v1284_v58 = vmul.f32 1.442695, %v1281_v10 }
 0x47f   :  { %2334 = vmatmul.mubr.msk.bf16.vlgmr.msra.gmra.mrb[28].mxu0 %vm520_vm2, %v1042_v46 }
 0x480   :  { %v2519_v11 = vpop.eup %2518  ;;  %2522 = vpow2.f32 %v1284_v58  ;;  %2345 = vmatprep.mubr.msk.bf16.mxu0 %vm2743_vm0, %v2742_v14 }
 0x481   :  { %v1403_v44 = vpop.xlane.xlu1 %1402  ;;  %v1158_v12 = vsel %vm520_vm2, %v2519_v11, 0.0 }
 0x482   :  { %v1407_v13 = vsub.f32 %v3051_v5, %v1403_v44  ;;  %1159 = vadd.xlane.f32.xlu0 %v1158_v12 }
 0x484   :  { %v2521_v17 = vpop.eup %2520  ;;  %v1409_v19 = vmul.f32 1.442695, %v1407_v13 }
 0x485   :  { %v1406_v21 = vpop.xlane.xlu1 %1405  ;;  %v1161_v22 = vsel %vm520_vm2, %v2521_v17, 0.0  ;;  %v1164_v63 = vpack.c.bf16 %v2521_v17, %v2519_v11 }
 0x486   :  { %v1408_v24 = vsub.f32 %v3057_v8, %v1406_v21  ;;  %1162 = vadd.xlane.f32.xlu1 %v1161_v22  ;;  %2524 = vpow2.f32 %v1409_v19 }
 0x488   :  { %v1411_v25 = vmul.f32 1.442695, %v1408_v24 }
 0x489   :  { %v1167_v27 = vpop.permute.xlu1 %1166 }
 0x48a   :  { %v2523_v28 = vpop.eup %2522  ;;  %2526 = vpow2.f32 %v1411_v25  ;;  %2344 = vmatpush3.bf16.msra.mxu0 %v1167_v27 }
 0x48b   :  { %v1289_v30 = vsel %vm520_vm2, %v2523_v28, 0.0  ;;  %2355 = vmatprep.subr.bf16.mxu0 %v2742_v14 }
 0x48c   :  { %1290 = vadd.xlane.f32.xlu1 %v1289_v30 }
 0x48d   :  { %2346 = vmatmul.mubr.msk.bf16.vlgmr.msra.gmra.mrb[32].mxu0 %vm520_vm2, %v1164_v63 }
 0x48e   :  { %2357 = vmatprep.mubr.msk.bf16.mxu0 %vm2743_vm0, %v2742_v14 }
 0x490   :  { %v2525_v5 = vpop.eup %2524 }
 0x494   :  { %v2527_v31 = vpop.eup %2526 }
 0x495   :  { %v1416_v8 = vsel %vm520_vm2, %v2527_v31, 0.0  ;;  %v1419_v33 = vpack.c.bf16 %v2527_v31, %v2525_v5 }
 0x496   :  { %1417 = vadd.xlane.f32.xlu1 %v1416_v8 }
 0x49a   :  { %537 = vadd.xlane.f32.xlu1 %v536_v20 }
 0x49e   :  { %1040 = vadd.xlane.f32.xlu1 %v1039_v34  ;;  %v1276_v23 = vpop.xlane.xlu0 %1275 }
 0x49f   :  { %v1280_v36 = vsub.f32 %v3036_v61, %v1276_v23  ;;  %v1413_v61 = vsel %vm520_vm2, %v2525_v5, 0.0 }
 0x4a1   :  { %v1282_v37 = vmul.f32 1.442695, %v1280_v36 }
 0x4a2   :  { %v1294_v38 = vpop.permute.xlu0 %1293 }
 0x4a3   :  { %2528 = vpow2.f32 %v1282_v37  ;;  %2356 = vmatpush3.bf16.msra.mxu0 %v1294_v38 }
 0x4a4   :  { %2367 = vmatprep.subr.bf16.mxu0 %v2742_v14 }
 0x4a6   :  { %v1421_v42 = vpop.permute.xlu0 %1420 }
 0x4ad   :  { %v2529_v26 = vpop.eup %2528 }
 0x4ae   :  { %v1286_v41 = vsel %vm520_vm2, %v2529_v26, 0.0  ;;  %v1292_v29 = vpack.c.bf16 %v2523_v28, %v2529_v26 }
 0x4af   :  { %1287 = vadd.xlane.f32.xlu0 %v1286_v41 }
 0x4b0   :  { %2358 = vmatmul.mubr.msk.bf16.vlgmr.msra.gmra.mrb[36].mxu0 %vm520_vm2, %v1292_v29 }
 0x4b1   :  { %2368 = vmatpush3.bf16.msra.mxu0 %v1421_v42  ;;  %2369 = vmatprep.mubr.msk.bf16.mxu0 %vm2743_vm0, %v2742_v14 }
 0x4b3   :  { %1414 = vadd.xlane.f32.xlu0 %v1413_v61 }
 0x4b7   :  { %534 = vadd.xlane.f32.xlu0 %v533_v3 }
 0x4b8   :  { %2370 = vmatmul.mubr.msk.bf16.vlgmr.msra.gmra.mrb[40].mxu0 %vm520_vm2, %v1419_v33 }
 0x4b9   :  { %1815 = vmatprep.mubr.bf16.mxu0 %v2741_v39 }
 0x4bb   :  { %1037 = vadd.xlane.f32.xlu0 %v1036_v32 }
 0x4c5   :  { %v577_v47 = vpop.f32.mrb[12].mxu0 }
 0x4c6   :  { %v2287_v35 = vpop.f32.mrb[13].mxu0 }
 0x4c7   :  { %v580_v48 = vpop.f32.mrb[14].mxu0 }
 0x4c8   :  { %v2288_v49 = vpop.f32.mrb[15].mxu0 }
 0x4c9   :  { %v2444_v49 = vld [vmem:[#allocation8 + $0x10] sm:$0xff]  }
 0x4ef   :  { %v657_v14 = vpop.xlane.xlu0 %656 }
 0x4f0   :  { %2530 = vrcp.f32 %v657_v14 }
 0x4f3   :  { %v660_v51 = vpop.xlane.xlu1 %659 }
 0x4f4   :  { %2532 = vrcp.f32 %v660_v51 }
 0x4f7   :  { %v786_v50 = vpop.xlane.xlu0 %785 }
 0x4f8   :  { %2534 = vrcp.f32 %v786_v50 }
 0x4fa   :  { %v2531_v45 = vpop.eup %2530 }
 0x4fb   :  { %v789_v52 = vpop.xlane.xlu0 %788 }
 0x4fc   :  { %2536 = vrcp.f32 %v789_v52 }
 0x4fe   :  { %v2533_v60 = vpop.eup %2532 }
 0x4ff   :  { %v914_v43 = vpop.xlane.xlu0 %913 }
 0x500   :  { %2538 = vrcp.f32 %v914_v43  ;;  %v2445_v43 = vld [vmem:[#allocation8 + $0x18] sm:$0xff]  }
 0x501   :  { %v917_v53 = vpop.xlane.xlu1 %916 }
 0x502   :  { %2540 = vrcp.f32 %v917_v53  ;;  %v2535_v10 = vpop.eup %2534 }
 0x506   :  { %v2537_v11 = vpop.eup %2536 }
 0x50a   :  { %v2539_v25 = vpop.eup %2538 }
 0x50c   :  { %v2541_v28 = vpop.eup %2540 }
 0x50f   :  { %v1160_v56 = vpop.xlane.xlu0 %1159 }
 0x513   :  { %v3133_v2 = vpop.xlane.xlu1 %1162 }
 0x519   :  { %v3135_v55 = vpop.xlane.xlu1 %1290 }
 0x523   :  { %v3137_v40 = vpop.xlane.xlu1 %1417 }
 0x527   :  { %v538_v54 = vpop.xlane.xlu1 %537 }
 0x528   :  { %2542 = vrcp.f32 %v538_v54 }
 0x52b   :  { %v1041_v21 = vpop.xlane.xlu1 %1040 }
 0x532   :  { %v2543_v5 = vpop.eup %2542 }
 0x533   :  { %v587_v23 = vmul.f32 %v2543_v5, %v580_v48  ;;  %v2443_v48 = vld [vmem:[#allocation8 + $0x8] sm:$0xff]  }
 0x53a   :  { %v703_v57 = vpop.f32.mrb[16].mxu0 }
 0x53b   :  { %v2299_v59 = vpop.f32.mrb[17].mxu0  ;;  %v711_v1 = vmul.f32 %v2531_v45, %v703_v57 }
 0x53c   :  { %v706_v62 = vpop.f32.mrb[18].mxu0  ;;  %v3139_v0 = vpop.xlane.xlu0 %1287  ;;  %v2446_v59 = vld [vmem:[#allocation8 + $0x20] sm:$0xff]  }
 0x53d   :  { %v713_v4 = vmul.f32 %v2533_v60, %v706_v62  ;;  %v2300_v6 = vpop.f32.mrb[19].mxu0  ;;  %v2447_v60 = vld [vmem:[#allocation8 + $0x28] sm:$0xff]  }
 0x53e   :  { %v2448_v6 = vld [vmem:[#allocation8 + $0x30] sm:$0xff]  }
 0x53f   :  { %v714_v7 = vpack.c.bf16 %v713_v4, %v711_v1 }
 0x540   :  { %v3141_v9 = vpop.xlane.xlu0 %1414 }
 0x541   :  { %716 = vrot.lane.b32.xlu0 %v714_v7, %s2745_s25 }
 0x542   :  { %v831_v46 = vpop.f32.mrb[20].mxu0 }
 0x543   :  { %v2311_v58 = vpop.f32.mrb[21].mxu0  ;;  %v839_v13 = vmul.f32 %v2535_v10, %v831_v46  ;;  %v2449_v46 = vld [vmem:[#allocation8 + $0x38] sm:$0xff]  }
 0x544   :  { %v834_v44 = vpop.f32.mrb[22].mxu0  ;;  %v535_v12 = vpop.xlane.xlu0 %534 }
 0x545   :  { %v841_v17 = vmul.f32 %v2537_v11, %v834_v44  ;;  %2544 = vrcp.f32 %v535_v12  ;;  %v2312_v19 = vpop.f32.mrb[23].mxu0 }
 0x547   :  { %v842_v22 = vpack.c.bf16 %v841_v17, %v839_v13 }
 0x548   :  { %v1038_v63 = vpop.xlane.xlu0 %1037 }
 0x549   :  { %2546 = vrcp.f32 %v1038_v63  ;;  %844 = vrot.lane.b32.xlu1 %v842_v22, %s2738_s0 }
 0x54a   :  { %2548 = vrcp.f32 %v1041_v21  ;;  %v959_v24 = vpop.f32.mrb[24].mxu0 }
 0x54b   :  { %v2323_v27 = vpop.f32.mrb[25].mxu0  ;;  %v967_v31 = vmul.f32 %v2539_v25, %v959_v24  ;;  %2550 = vrcp.f32 %v1160_v56 }
 0x54c   :  { %v962_v30 = vpop.f32.mrb[26].mxu0  ;;  %2552 = vrcp.f32 %v3133_v2 }
 0x54d   :  { %v969_v8 = vmul.f32 %v2541_v28, %v962_v30  ;;  %v2324_v33 = vpop.f32.mrb[27].mxu0  ;;  %2554 = vrcp.f32 %v3135_v55 }
 0x54e   :  { %2556 = vrcp.f32 %v3139_v0 }
 0x54f   :  { %v2545_v20 = vpop.eup %2544  ;;  %v970_v34 = vpack.c.bf16 %v969_v8, %v967_v31  ;;  %2558 = vrcp.f32 %v3141_v9  ;;  %v2141_v8 = vld [vmem:[%s3237_s6] ss:$0 sm:$0xff] }
 0x550   :  { %v585_v36 = vmul.f32 %v2545_v20, %v577_v47  ;;  %v2442_v47 = vld [vmem:[#allocation8] sm:$0xff]   ;;  %2560 = vrcp.f32 %v3137_v40 }
 0x551   :  { %972 = vrot.lane.b32.xlu1 %v970_v34, %s2744_s4  ;;  %2373 = vmatprep.subr.bf16.mxu1 %v2442_v47  ;;  %v2586_v20 = vld [vmem:[#allocation3] sm:$0xff] }
 0x552   :  { %v1080_v37 = vpop.f32.mrb[28].mxu0  ;;  %v588_v38 = vpack.c.bf16 %v587_v23, %v585_v36  ;;  %2374 = vmatpush3.bf16.msra.mxu1 %v2442_v47  ;;  %v2450_v47 = vld [vmem:[#allocation9] ss:$8 sps:$4 sm:$0xff]  }
 0x553   :  { %v2547_v26 = vpop.eup %2546  ;;  %v2335_v41 = vpop.f32.mrb[29].mxu0  ;;  %2375 = vmatprep.subr.bf16.mxu1 %v2443_v48 }
 0x554   :  { %v2549_v29 = vpop.eup %2548  ;;  %v1088_v42 = vmul.f32 %v2547_v26, %v1080_v37  ;;  %v1083_v61 = vpop.f32.mrb[30].mxu0  ;;  %589 = vst.msk [vmem:[#allocation2] sm:$0xff] %vm472_vm1, %v588_v38  ;;  %v2587_v37 = vld [vmem:[#allocation3 + $0x10] sm:$0xff]  ;;  %v2588_v41 = vld [vmem:[#allocation3 + $0x8] sm:$0xff] }
 0x555   :  { %v1090_v3 = vmul.f32 %v2549_v29, %v1083_v61  ;;  %v2336_v32 = vpop.f32.mrb[31].mxu0  ;;  %v2551_v50 = vpop.eup %2550 }
 0x556   :  { %2376 = vmatpush3.bf16.msra.mxu1 %v2443_v48  ;;  %v2553_v52 = vpop.eup %2552  ;;  %v2452_v48 = vld [vmem:[#allocation9 + $0x4] ss:$8 sps:$4 sm:$0xff]  }
 0x557   :  { %v1091_v35 = vpack.c.bf16 %v1090_v3, %v1088_v42  ;;  %2377 = vmatprep.subr.bf16.mxu1 %v2444_v49  ;;  %v2555_v1 = vpop.eup %2554  ;;  %v2589_v3 = vld [vmem:[#allocation3 + $0x18] sm:$0xff]  ;;  %1783 = vmatprep.subr.bf16.mxu0 %v2452_v48 }
 0x558   :  { %v2557_v7 = vpop.eup %2556  ;;  %1784 = vmatpush1.bf16.msra.mxu0 %v2450_v47 }
 0x559   :  { %1092 = vst.msk [vmem:[#allocation2 + $0x8] sm:$0xff] %vm472_vm1, %v1091_v35  ;;  %v2559_v9 = vpop.eup %2558 }
 0x55a   :  { %2378 = vmatpush3.bf16.msra.mxu1 %v2444_v49  ;;  %v2561_v12 = vpop.eup %2560  ;;  %v2455_v49 = vld [vmem:[#allocation9 + $0x14] ss:$8 sps:$4 sm:$0xff]  }
 0x55b   :  { %2379 = vmatprep.subr.bf16.mxu1 %v2445_v43  ;;  %1785 = vmatprep.subr.bf16.mxu0 %v2455_v49 }
 0x55e   :  { %2380 = vmatpush3.bf16.msra.mxu1 %v2445_v43 }
 0x55f   :  { %2381 = vmatprep.subr.bf16.mxu1 %v2446_v59 }
 0x560   :  { %v1206_v14 = vpop.f32.mrb[32].mxu0 }
 0x561   :  { %v2347_v51 = vpop.f32.mrb[33].mxu0  ;;  %v1214_v56 = vmul.f32 %v2551_v50, %v1206_v14  ;;  %v2453_v14 = vld [vmem:[#allocation9 + $0x10] ss:$8 sps:$4 sm:$0xff]  }
 0x562   :  { %v1209_v53 = vpop.f32.mrb[34].mxu0  ;;  %2382 = vmatpush3.bf16.msra.mxu1 %v2446_v59  ;;  %1786 = vmatpush1.bf16.msra.mxu0 %v2453_v14 }
 0x563   :  { %v1216_v57 = vmul.f32 %v2553_v52, %v1209_v53  ;;  %v2348_v45 = vpop.f32.mrb[35].mxu0  ;;  %2383 = vmatprep.subr.bf16.mxu1 %v2447_v60 }
 0x565   :  { %v1217_v2 = vpack.c.bf16 %v1216_v57, %v1214_v56 }
 0x566   :  { %2384 = vmatpush3.bf16.msra.mxu1 %v2447_v60 }
 0x567   :  { %1219 = vrot.lane.b32.xlu1 %v1217_v2, %s2745_s25  ;;  %2385 = vmatprep.subr.bf16.mxu1 %v2448_v6 }
 0x56a   :  { %2386 = vmatpush3.bf16.msra.mxu1 %v2448_v6 }
 0x56b   :  { %2387 = vmatprep.subr.bf16.mxu1 %v2449_v46 }
 0x56e   :  { %2388 = vmatpush3.bf16.msra.mxu1 %v2449_v46  ;;  %v2456_v46 = vld [vmem:[#allocation9 + $0x20] ss:$8 sps:$4 sm:$0xff]  }
 0x583   :  { %v1333_v62 = vpop.f32.mrb[36].mxu0 }
 0x584   :  { %v2359_v4 = vpop.f32.mrb[37].mxu0  ;;  %v1341_v55 = vmul.f32 %v2557_v7, %v1333_v62 }
 0x585   :  { %v1336_v54 = vpop.f32.mrb[38].mxu0 }
 0x586   :  { %v1343_v10 = vmul.f32 %v2555_v1, %v1336_v54  ;;  %v2360_v0 = vpop.f32.mrb[39].mxu0  ;;  %v2458_v54 = vld [vmem:[#allocation9 + $0x24] ss:$8 sps:$4 sm:$0xff]  }
 0x587   :  { %1787 = vmatprep.subr.bf16.mxu0 %v2458_v54  ;;  %v2464_v0 = vld [vmem:[#allocation9 + $0x44] ss:$8 sps:$4 sm:$0xff]   ;;  %v2487_v54 = vld [vmem:[#allocation11 + $0x30] sm:$0xff]  }
 0x588   :  { %v1344_v58 = vpack.c.bf16 %v1343_v10, %v1341_v55  ;;  %1788 = vmatpush1.bf16.msra.mxu0 %v2456_v46  ;;  %v2461_v55 = vld [vmem:[#allocation9 + $0x34] ss:$8 sps:$4 sm:$0xff]   ;;  %v2459_v10 = vld [vmem:[#allocation9 + $0x30] ss:$8 sps:$4 sm:$0xff]  }
 0x589   :  { %1789 = vmatprep.subr.bf16.mxu0 %v2461_v55  ;;  %v2488_v46 = vld [vmem:[#allocation11 + $0x78] sm:$0xff]  }
 0x58a   :  { %1346 = vrot.lane.b32.xlu0 %v1344_v58, %s2738_s0  ;;  %v2462_v58 = vld [vmem:[#allocation9 + $0x40] ss:$8 sps:$4 sm:$0xff]   ;;  %v2489_v55 = vld [vmem:[#allocation11 + $0x38] sm:$0xff]  }
 0x58b   :  { %v1460_v11 = vpop.f32.mrb[40].mxu0 }
 0x58c   :  { %v1468_v40 = vmul.f32 %v2559_v9, %v1460_v11  ;;  %v2371_v44 = vpop.f32.mrb[41].mxu0  ;;  %1790 = vmatpush1.bf16.msra.mxu0 %v2459_v10  ;;  %v2467_v9 = vld [vmem:[#allocation9 + $0x54] ss:$8 sps:$4 sm:$0xff]   ;;  %v2465_v11 = vld [vmem:[#allocation9 + $0x50] ss:$8 sps:$4 sm:$0xff]  }
 0x58d   :  { %v1463_v13 = vpop.f32.mrb[42].mxu0  ;;  %1791 = vmatprep.subr.bf16.mxu0 %v2464_v0  ;;  %v2468_v44 = vld [vmem:[#allocation9 + $0x60] ss:$8 sps:$4 sm:$0xff]   ;;  %v1691_v10 = vld [vmem:[%s3241_s10] sm:$0x3] }
 0x58e   :  { %v1470_v17 = vmul.f32 %v2561_v12, %v1463_v13  ;;  %v2372_v19 = vpop.f32.mrb[43].mxu0  ;;  %v2473_v12 = vld [vmem:[#allocation9 + $0x74] ss:$8 sps:$4 sm:$0xff]   ;;  %v2471_v13 = vld [vmem:[#allocation9 + $0x70] ss:$8 sps:$4 sm:$0xff]   ;;  %v1696_v0 = vrot.slane %v1691_v10, %v223_v16 }
 0x58f   :  { %v2475_v19 = vld [vmem:[#allocation11] sm:$0xff]  }
 0x590   :  { %v1471_v21 = vpack.c.bf16 %v1470_v17, %v1468_v40  ;;  %1792 = vmatpush1.bf16.msra.mxu0 %v2462_v58  ;;  %v2470_v40 = vld [vmem:[#allocation9 + $0x64] ss:$8 sps:$4 sm:$0xff]   ;;  %v1700_v58 = vrot.slane %v1691_v10, %v227_v18 }
 0x591   :  { %1793 = vmatprep.subr.bf16.mxu0 %v2467_v9  ;;  %v2474_v17 = vld [vmem:[#allocation11 + $0x40] sm:$0xff]  }
 0x592   :  { %1473 = vrot.lane.b32.xlu1 %v1471_v21, %s2744_s4  ;;  %v2476_v21 = vld [vmem:[#allocation11 + $0x48] sm:$0xff]   ;;  %2229 = vmatprep.subr.bf16.mxu1 %v2474_v17 }
 0x594   :  { %1794 = vmatpush1.bf16.msra.mxu0 %v2465_v11 }
 0x595   :  { %1795 = vmatprep.subr.bf16.mxu0 %v2470_v40 }
 0x598   :  { %1796 = vmatpush1.bf16.msra.mxu0 %v2468_v44 }
 0x599   :  { %1797 = vmatprep.subr.bf16.mxu0 %v2473_v12 }
 0x59c   :  { %1798 = vmatpush1.bf16.msra.mxu0 %v2471_v13 }
 0x5b3   :  { %v717_v22 = vpop.permute.xlu0 %716 }
 0x5b4   :  { %720 = vst.msk [vmem:[#allocation2] sm:$0xff] %vm719_vm3, %v717_v22  ;;  %v2477_v22 = vld [vmem:[#allocation11 + $0x8] sm:$0xff]  }
 0x5bb   :  { %v845_v63 = vpop.permute.xlu1 %844 }
 0x5bc   :  { %848 = vst.msk [vmem:[#allocation2] sm:$0xff] %vm847_vm4, %v845_v63 }
 0x5c3   :  { %v973_v24 = vpop.permute.xlu1 %972 }
 0x5c4   :  { %976 = vst.msk [vmem:[#allocation2] sm:$0xff] %vm975_vm5, %v973_v24 }
 0x5cb   :  { %v1477_v25 = vld [vmem:[#allocation2] sm:$0xff] }
 0x5cc   :  { %2389 = vmatprep.mubr.bf16.mxu1 %v1477_v25 }
 0x5d9   :  { %v1220_v27 = vpop.permute.xlu1 %1219 }
 0x5da   :  { %1222 = vst.msk [vmem:[#allocation2 + $0x8] sm:$0xff] %vm719_vm3, %v1220_v27 }
 0x5fc   :  { %v1347_v28 = vpop.permute.xlu0 %1346 }
 0x5fd   :  { %1349 = vst.msk [vmem:[#allocation2 + $0x8] sm:$0xff] %vm847_vm4, %v1347_v28 }
 0x604   :  { %v1474_v30 = vpop.permute.xlu1 %1473 }
 0x605   :  { %1476 = vst.msk [vmem:[#allocation2 + $0x8] sm:$0xff] %vm975_vm5, %v1474_v30 }
 0x60c   :  { %v1478_v5 = vld [vmem:[#allocation2 + $0x8] sm:$0xff] }
 0x60d   :  { %2390 = vmatmul.mubr.bf16.vlgmr.msra.gmra.mrb[32].mxu1 %v1478_v5 }
 0x60e   :  { %2230 = vmatpush3.bf16.msra.mxu1 %v2475_v19 }
 0x60f   :  { %2231 = vmatprep.subr.bf16.mxu1 %v2476_v21 }
 0x612   :  { %2232 = vmatpush3.bf16.msra.mxu1 %v2477_v22 }
 0x6e0   :  { %v2391_v31 = vpop.f32.mrb[32].mxu1 }
 0x6e1   :  { %v1577_v33 = vpop.f32.mrb[33].mxu1  ;;  %v1594_v38 = vadd.f32 %v2587_v37, %v2391_v31 }
 0x6e2   :  { %v1592_v34 = vadd.f32 %v2586_v20, %v1577_v33  ;;  %v2392_v23 = vpop.f32.mrb[34].mxu1 }
 0x6e3   :  { %v1580_v36 = vpop.f32.mrb[35].mxu1  ;;  %v3164_v61 = vadd.f32 %v2141_v8, %v1594_v38  ;;  %v1595_v32 = vadd.f32 %v2589_v3, %v2392_v23 }
 0x6e4   :  { %v3159_v26 = vadd.f32 %v2141_v8, %v1592_v34  ;;  %v1593_v29 = vadd.f32 %v2588_v41, %v1580_v36  ;;  %v2142_v36 = vld [vmem:[%s3238_s7] ss:$0 sm:$0xff] }
 0x6e5   :  { %v3168_v35 = vadd.f32 %v2141_v8, %v1595_v32  ;;  %v2143_v32 = vld [vmem:[%s3239_s8] ss:$0 sm:$0xff] }
 0x6e6   :  { %v3161_v42 = vadd.f32 %v2141_v8, %v1593_v29  ;;  %1609 = vadd.xlane.f32.xlu0 %v3159_v26 }
 0x6e8   :  { %1611 = vadd.xlane.f32.xlu1 %v3161_v42 }
 0x6ea   :  { %1613 = vadd.xlane.f32.xlu0 %v3164_v61 }
 0x6ee   :  { %1615 = vadd.xlane.f32.xlu0 %v3168_v35 }
 0x773   :  { %v1610_v50 = vpop.xlane.xlu0 %1609 }
 0x774   :  { %v1617_v51 = vmul.f32 0.0078125, %v1610_v50 }
 0x775   :  { %v1612_v52 = vpop.xlane.xlu1 %1611 }
 0x776   :  { %v3172_v53 = vsub.f32 %v3159_v26, %v1617_v51  ;;  %v1618_v43 = vmul.f32 0.0078125, %v1612_v52 }
 0x777   :  { %v1614_v56 = vpop.xlane.xlu0 %1613 }
 0x778   :  { %v3175_v57 = vsub.f32 %v3161_v42, %v1618_v43  ;;  %v1619_v45 = vmul.f32 0.0078125, %v1614_v56  ;;  %v1625_v2 = vmul.f32 %v3172_v53, %v3172_v53 }
 0x77a   :  { %v3180_v59 = vsub.f32 %v3164_v61, %v1619_v45  ;;  %1629 = vadd.xlane.f32.xlu0 %v1625_v2  ;;  %v1626_v60 = vmul.f32 %v3175_v57, %v3175_v57  ;;  %v2478_v2 = vld [vmem:[#allocation11 + $0x50] sm:$0xff]  }
 0x77b   :  { %v1616_v62 = vpop.xlane.xlu0 %1615  ;;  %2233 = vmatprep.subr.bf16.mxu1 %v2478_v2 }
 0x77c   :  { %v1620_v1 = vmul.f32 0.0078125, %v1616_v62  ;;  %1631 = vadd.xlane.f32.xlu1 %v1626_v60  ;;  %v1627_v4 = vmul.f32 %v3180_v59, %v3180_v59  ;;  %v2479_v60 = vld [vmem:[#allocation11 + $0x10] sm:$0xff]   ;;  %v2480_v62 = vld [vmem:[#allocation11 + $0x58] sm:$0xff]  }
 0x77d   :  { %2234 = vmatpush3.bf16.msra.mxu1 %v2479_v60 }
 0x77e   :  { %v3187_v6 = vsub.f32 %v3168_v35, %v1620_v1  ;;  %1633 = vadd.xlane.f32.xlu0 %v1627_v4  ;;  %v2481_v1 = vld [vmem:[#allocation11 + $0x18] sm:$0xff]   ;;  %2235 = vmatprep.subr.bf16.mxu1 %v2480_v62  ;;  %v2483_v4 = vld [vmem:[#allocation11 + $0x20] sm:$0xff]  }
 0x780   :  { %v1628_v7 = vmul.f32 %v3187_v6, %v3187_v6 }
 0x781   :  { %2236 = vmatpush3.bf16.msra.mxu1 %v2481_v1 }
 0x782   :  { %1635 = vadd.xlane.f32.xlu1 %v1628_v7  ;;  %v2485_v7 = vld [vmem:[#allocation11 + $0x28] sm:$0xff]  }
 0x807   :  { %v1630_v63 = vpop.xlane.xlu0 %1629 }
 0x808   :  { %v1637_v24 = vmul.f32 0.0078125, %v1630_v63 }
 0x809   :  { %v1632_v25 = vpop.xlane.xlu1 %1631 }
 0x80a   :  { %v1641_v27 = vadd.f32 1e-06, %v1637_v24  ;;  %v1638_v28 = vmul.f32 0.0078125, %v1632_v25 }
 0x80b   :  { %v1634_v30 = vpop.xlane.xlu0 %1633 }
 0x80c   :  { %2562 = vrsqrt.f32 %v1641_v27  ;;  %v1642_v5 = vadd.f32 1e-06, %v1638_v28  ;;  %v1639_v31 = vmul.f32 0.0078125, %v1634_v30 }
 0x80e   :  { %2564 = vrsqrt.f32 %v1642_v5  ;;  %v1643_v8 = vadd.f32 1e-06, %v1639_v31 }
 0x80f   :  { %v1636_v33 = vpop.xlane.xlu1 %1635 }
 0x810   :  { %2566 = vrsqrt.f32 %v1643_v8  ;;  %v1640_v20 = vmul.f32 0.0078125, %v1636_v33 }
 0x812   :  { %v1644_v34 = vadd.f32 1e-06, %v1640_v20 }
 0x814   :  { %2568 = vrsqrt.f32 %v1644_v34 }
 0x816   :  { %v2563_v23 = vpop.eup %2562 }
 0x817   :  { %v1649_v37 = vmul.f32 %v2563_v23, %v3172_v53 }
 0x818   :  { %v2565_v38 = vpop.eup %2564 }
 0x819   :  { %v1650_v41 = vmul.f32 %v2565_v38, %v3175_v57  ;;  %v1659_v29 = vmul.f32 %v2142_v36, %v1649_v37 }
 0x81a   :  { %v2567_v3 = vpop.eup %2566 }
 0x81b   :  { %v1660_v47 = vmul.f32 %v2142_v36, %v1650_v41  ;;  %v1669_v48 = vadd.f32 %v2143_v32, %v1659_v29  ;;  %v1651_v14 = vmul.f32 %v2567_v3, %v3180_v59  ;;  %v2482_v59 = vld [vmem:[#allocation11 + $0x60] sm:$0xff]  }
 0x81c   :  { %2237 = vmatprep.subr.bf16.mxu1 %v2482_v59 }
 0x81d   :  { %v1670_v49 = vadd.f32 %v2143_v32, %v1660_v47  ;;  %v1661_v53 = vmul.f32 %v2142_v36, %v1651_v14  ;;  %2238 = vmatpush3.bf16.msra.mxu1 %v2483_v4 }
 0x81e   :  { %v2569_v50 = vpop.eup %2568 }
 0x81f   :  { %v1673_v51 = vpack.c.bf16 %v1670_v49, %v1669_v48  ;;  %v1652_v52 = vmul.f32 %v2569_v50, %v3187_v6  ;;  %v1671_v57 = vadd.f32 %v2143_v32, %v1661_v53  ;;  %v2484_v6 = vld [vmem:[#allocation11 + $0x68] sm:$0xff]  }
 0x820   :  { %2239 = vmatprep.subr.bf16.mxu1 %v2484_v6 }
 0x821   :  { %1816 = vmatmul.mubr.bf16.vlgmr.msra.gmra.mrb[44].mxu0 %v1673_v51  ;;  %v1662_v43 = vmul.f32 %v2142_v36, %v1652_v52  ;;  %2240 = vmatpush3.bf16.msra.mxu1 %v2485_v7 }
 0x822   :  { %1825 = vmatprep.mubr.bf16.mxu0 %v2741_v39  ;;  %v2486_v39 = vld [vmem:[#allocation11 + $0x70] sm:$0xff]  }
 0x823   :  { %v1672_v56 = vadd.f32 %v2143_v32, %v1662_v43  ;;  %2241 = vmatprep.subr.bf16.mxu1 %v2486_v39 }
 0x825   :  { %v1674_v45 = vpack.c.bf16 %v1672_v56, %v1671_v57  ;;  %2242 = vmatpush3.bf16.msra.mxu1 %v2487_v54 }
 0x826   :  { %2243 = vmatprep.subr.bf16.mxu1 %v2488_v46 }
 0x829   :  { %1826 = vmatmul.mubr.bf16.gmra.mrb[48].mxu0 %v1674_v45  ;;  %2244 = vmatpush3.bf16.msra.mxu1 %v2489_v55 }
 0x8f4   :  { %v1817_v9 = vpop.f32.mrb[44].mxu0 }
 0x8f5   :  { %v1818_v11 = vadd.f32 %v1817_v9, %v1696_v0  ;;  %v1819_v40 = vpop.f32.mrb[45].mxu0 }
 0x8f6   :  { %v1820_v44 = vadd.f32 %v1819_v40, %v1700_v58  ;;  %v1821_v12 = vpop.f32.mrb[46].mxu0 }
 0x8f7   :  { %v1844_v13 = vmul.f32 0.70710677, %v1818_v11  ;;  %v1822_v17 = vadd.f32 %v1821_v12, %v1696_v0  ;;  %v1823_v19 = vpop.f32.mrb[47].mxu0  ;;  %v1836_v29 = vmul.f32 0.5, %v1818_v11  ;;  %v2160_v11 = vld [vmem:[%s3243_s12] ss:$0 sm:$0xff] }
 0x8f8   :  { %v1845_v21 = vmul.f32 0.70710677, %v1820_v44  ;;  %v1824_v22 = vadd.f32 %v1823_v19, %v1700_v58  ;;  %v1837_v47 = vmul.f32 0.5, %v1820_v44  ;;  %s2746_s12 = smov [#allocation12]  }
 0x8f9   :  { %2570 = verf.f32 %v1844_v13  ;;  %v1846_v63 = vmul.f32 0.70710677, %v1822_v17  ;;  %v1838_v3 = vmul.f32 0.5, %v1822_v17  ;;  %s2077_s23 = sshll.u32 %s2746_s12, 4  ;;  %s2078_s23 = int_to_ptr.vmem [resolvable:$true] %s2077_s23 }
 0x8fa   :  { %2572 = verf.f32 %v1845_v21  ;;  %v1847_v24 = vmul.f32 0.70710677, %v1824_v22  ;;  %v1839_v48 = vmul.f32 0.5, %v1824_v22  ;;  %s2700_s14 = scalar_lea.vmem %s2078_s23, 512  ;;  %p2705_p13 = scmp.lt.s32.totalorder %s2078_s23, %s2078_s23 }
 0x8fb   :  { %2574 = verf.f32 %v1846_v63  ;;  %p2701_p12 = scmp.ne.s32.totalorder %s2078_s23, %s2700_s14  ;;  %p2706_p0 = scmp.lt.s32.totalorder %s2700_s14, %s2700_s14 }
 0x8fc   :  { %2576 = verf.f32 %v1847_v24  ;;  %v1827_v16 = vpop.f32.mrb[48].mxu0 }
 0x8fd   :  { %v1828_v25 = vadd.f32 %v1827_v16, %v1696_v0  ;;  %v1829_v15 = vpop.f32.mrb[49].mxu0  ;;  %p2707_p1 = por %p2706_p0, %p2705_p13 }
 0x8fe   :  { %v1830_v18 = vadd.f32 %v1829_v15, %v1700_v58  ;;  %v1831_v27 = vpop.f32.mrb[50].mxu0 }
 0x8ff   :  { %v1848_v28 = vmul.f32 0.70710677, %v1828_v25  ;;  %v1832_v30 = vadd.f32 %v1831_v27, %v1696_v0  ;;  %v1833_v5 = vpop.f32.mrb[51].mxu0  ;;  %v1840_v1 = vmul.f32 0.5, %v1828_v25  ;;  %p2708_p2 = pnand %p2707_p1, %p2701_p12 }
 0x900   :  { %v1849_v31 = vmul.f32 0.70710677, %v1830_v18  ;;  %v1834_v8 = vadd.f32 %v1833_v5, %v1700_v58  ;;  %v1841_v6 = vmul.f32 0.5, %v1830_v18 }
 0x901   :  { %2578 = verf.f32 %v1848_v28  ;;  %v1850_v33 = vmul.f32 0.70710677, %v1832_v30  ;;  %v1842_v59 = vmul.f32 0.5, %v1832_v30 }
 0x902   :  { %2580 = verf.f32 %v1849_v31  ;;  %v1851_v20 = vmul.f32 0.70710677, %v1834_v8  ;;  %v1843_v7 = vmul.f32 0.5, %v1834_v8 }
 0x903   :  { %v2571_v34 = vpop.eup %2570  ;;  %2582 = verf.f32 %v1850_v33 }
 0x904   :  { %v2573_v23 = vpop.eup %2572  ;;  %v1860_v36 = vadd.f32 1.0, %v2571_v34  ;;  %2584 = verf.f32 %v1851_v20 }
 0x905   :  { %v2575_v37 = vpop.eup %2574  ;;  %v1861_v38 = vadd.f32 1.0, %v2573_v23 }
 0x906   :  { %v2577_v41 = vpop.eup %2576  ;;  %v1862_v32 = vadd.f32 1.0, %v2575_v37  ;;  %v1868_v14 = vmul.f32 %v1860_v36, %v1836_v29 }
 0x907   :  { %v1863_v49 = vadd.f32 1.0, %v2577_v41  ;;  %v1869_v51 = vmul.f32 %v1861_v38, %v1837_v47 }
 0x908   :  { %v1870_v50 = vmul.f32 %v1862_v32, %v1838_v3 }
 0x909   :  { %v1871_v52 = vmul.f32 %v1863_v49, %v1839_v48 }
 0x90a   :  { %v1876_v53 = vpack.c.bf16 %v1870_v50, %v1868_v14 }
 0x90b   :  { %v2579_v43 = vpop.eup %2578  ;;  %v1877_v56 = vpack.c.bf16 %v1871_v52, %v1869_v51 }
 0x90c   :  { %v2581_v57 = vpop.eup %2580  ;;  %v1864_v45 = vadd.f32 1.0, %v2579_v43 }
 0x90d   :  { %v2583_v2 = vpop.eup %2582  ;;  %v1865_v60 = vadd.f32 1.0, %v2581_v57  ;;  %2047 = vmatprep.mubr.bf16.mxu1 %v1877_v56 }
 0x90e   :  { %v2585_v62 = vpop.eup %2584  ;;  %v1866_v4 = vadd.f32 1.0, %v2583_v2  ;;  %2048 = vmatmul.mubr.bf16.vlgmr.msra.gmra.mrb[36].mxu1 %v1876_v53  ;;  %v1872_v54 = vmul.f32 %v1864_v45, %v1840_v1 }
 0x90f   :  { %v1867_v39 = vadd.f32 1.0, %v2585_v62  ;;  %v1873_v55 = vmul.f32 %v1865_v60, %v1841_v6 }
 0x910   :  { %v1874_v46 = vmul.f32 %v1866_v4, %v1842_v59 }
 0x911   :  { %v1875_v10 = vmul.f32 %v1867_v39, %v1843_v7 }
 0x912   :  { %v1878_v0 = vpack.c.bf16 %v1874_v46, %v1872_v54 }
 0x913   :  { %v1879_v58 = vpack.c.bf16 %v1875_v10, %v1873_v55 }
 0x915   :  { %2055 = vmatprep.mubr.bf16.mxu1 %v1879_v58 }
 0x916   :  { %2056 = vmatmul.mubr.bf16.gmra.mrb[40].mxu1 %v1878_v0 }
 0x9e1   :  { %v2245_v9 = vpop.f32.mrb[36].mxu1 }
 0x9e2   :  { %v2246_v40 = vpop.f32.mrb[37].mxu1 }
 0x9e3   :  { %v2247_v44 = vadd.f32 %v2246_v40, %v2245_v9  ;;  %v2248_v12 = vpop.f32.mrb[38].mxu1 }
 0x9e4   :  { %v2249_v13 = vpop.f32.mrb[39].mxu1 }
 0x9e5   :  { %v2050_v17 = vadd.f32 %v2247_v44, %v2160_v11  ;;  %v2250_v19 = vadd.f32 %v2249_v13, %v2248_v12 }
 0x9e7   :  { %v2064_v21 = vadd.f32 %v2050_v17, %v3159_v26  ;;  %v2053_v22 = vadd.f32 %v2250_v19, %v2160_v11 }
 0x9e9   :  { %2068 = vst [vmem:[#allocation12] sm:$0xff] %v2064_v21  ;;  %v2065_v63 = vadd.f32 %v2053_v22, %v3161_v42  ;;  %v2251_v24 = vpop.f32.mrb[40].mxu1 }
 0x9ea   :  { %v2252_v16 = vpop.f32.mrb[41].mxu1 }
 0x9eb   :  { %2069 = vst [vmem:[#allocation12 + $0x8] sm:$0xff] %v2065_v63  ;;  %v2253_v25 = vadd.f32 %v2252_v16, %v2251_v24  ;;  %v2254_v15 = vpop.f32.mrb[42].mxu1 }
 0x9ec   :  { %v2255_v18 = vpop.f32.mrb[43].mxu1 }
 0x9ed   :  { %v2058_v27 = vadd.f32 %v2253_v25, %v2160_v11  ;;  %v2256_v28 = vadd.f32 %v2255_v18, %v2254_v15 }
 0x9ef   :  { %v2066_v30 = vadd.f32 %v2058_v27, %v3164_v61  ;;  %v2061_v5 = vadd.f32 %v2256_v28, %v2160_v11 }
 0x9f1   :  { %2070 = vst [vmem:[#allocation12 + $0x10] sm:$0xff] %v2066_v30  ;;  %v2067_v26 = vadd.f32 %v2061_v5, %v3168_v35 }
 0x9f3   :  { %2071 = vst [vmem:[#allocation12 + $0x18] sm:$0xff] %v2067_v26 }
 0x9f4   :  { %2711 = shalt.err (!%p2708_p2)
}
 0x9f5   :  { %s2712_s18 = scalar_lea.hbm %s3244_s13, 512 }
 0x9f6   :  { %p2713_p3 = scmp.ne.s32.totalorder %s3244_s13, %s2712_s18  ;;  %p2716_p4 = scmp.lt.u32.totalorder %s2712_s18, %s3244_s13 }
 0x9f8   :  { %p2718_p5 = pnand %p2716_p4, %p2713_p3 }
 0x9fa   :  { %2721 = shalt.err (!%p2718_p5)
}
 0x9fb   :  { %2083 = dma.vmem_to_hbm [thread:$0]  %s2078_s23, 512, %s3244_s13, [#allocation5], %s2735_s26, %s2735_s26, %s2736_s17  }
 0x9fc   :  { %2728 = dma.done.wait [#allocation5], 512  }
 0x9fd   :  { %2729 = vsyncadd [#allocation5], 4294966784 }
 0x9fe   :  { %2087 = vsyncpa [#allocation4], 1 }
 0x9ff   :  { %2088 = vsyncpa [#allocation7], 1 }
 0xa00   :  { %2089 = vsyncpa [#allocation10], 1 }
 0xa01   :  { %2090 = vsyncpa [#allocation5], 1 }

</bundles_post_ra>
